<compile_context>
chip_gen: v7x
topology: tpu7x:2x2x1
jax: 0.10.0
libtpu: 0.0.40
codegen_flags: <defaults>
</compile_context>

<pallas_src>
import jax
import jax.numpy as jnp
from jax.experimental import pallas as pl
from jax.experimental.pallas import tpu as pltpu


# ---------------------------------------------------------------------------
# Kernel: one grid step runs `mb` independent MLPs.
# ---------------------------------------------------------------------------
def _mlp_block_kernel(x_ref, w1_ref, b1_ref, w2_ref, b2_ref, o_ref):
    # x_ref : (mb, B, Din)    w1_ref: (mb, Din, H)   b1_ref: (mb, 1, H)
    # w2_ref: (mb, H, Dout)   b2_ref: (mb, 1, Dout)  o_ref : (B, mb*Dout)
    mb = x_ref.shape[0]
    dout = w2_ref.shape[2]
    # Static unroll over the models of this block (mb is capped in the
    # wrapper).  The MXU has no batch mode, so a batched einsum would lower to
    # the same per-model matmuls; the explicit loop keeps vreg pressure low
    # and lets each result be stored straight into its lane slice of the
    # lane-dense output slab.
    for m in range(mb):
        x_m = x_ref[m]                                   # (B, Din)
        h = jnp.dot(x_m, w1_ref[m], preferred_element_type=jnp.float32)
        h = jnp.maximum(h + b1_ref[m].astype(jnp.float32), 0.0)   # (B, H)
        w2_m = w2_ref[m]                                 # (H, Dout)
        # bf16 path: cast the activation to the weight dtype so MXU operands
        # match (intentional numerics choice, mirrored by the reference);
        # accumulation stays f32.
        out_m = jnp.dot(h.astype(w2_m.dtype), w2_m,
                        preferred_element_type=jnp.float32)
        out_m = out_m + b2_ref[m].astype(jnp.float32)    # (B, Dout)
        o_ref[:, m * dout:(m + 1) * dout] = out_m.astype(o_ref.dtype)


# ---------------------------------------------------------------------------
# VMEM sizing / block selection.
# ---------------------------------------------------------------------------
_MAX_UNROLL = 32                       # cap on models per grid step (compile time)
_BLOCK_BUDGET = 8 * 1024 * 1024        # double-buffered working set per step
_VMEM_LIMIT = 32 * 1024 * 1024         # scoped VMEM request (fits v5e/v6e/v7x)


def _round_up(n, m):
    return ((n + m - 1) // m) * m


def _tile_bytes(rows, cols, dtype):
    item = jnp.dtype(dtype).itemsize
    sublane = 8 * max(1, 4 // item)            # f32 -> 8, bf16 -> 16
    return _round_up(max(rows, 1), sublane) * _round_up(max(cols, 1), 128) * item


def _block_vmem_bytes(mb, B, Din, H, Dout, param_dtype, x_dtype, out_dtype):
    streamed = (mb * _tile_bytes(B, Din, x_dtype)
                + mb * _tile_bytes(Din, H, param_dtype)
                + mb * _tile_bytes(1, H, param_dtype)
                + mb * _tile_bytes(H, Dout, param_dtype)
                + mb * _tile_bytes(1, Dout, param_dtype)
                + _tile_bytes(B, mb * Dout, out_dtype))
    transient = 2 * (_tile_bytes(B, H, jnp.float32)
                     + _tile_bytes(B, Dout, jnp.float32))
    return 2 * streamed + transient            # x2: double-buffered pipelining


def _device_kind():
    try:
        return jax.devices()[0].device_kind.lower()
    except Exception:
        return ""


def _min_grid_blocks():
    kind = _device_kind()
    # v7x has 2 TensorCores per chip: keep enough independent ("parallel")
    # blocks to shard across both cores and still pipeline DMAs on each.
    return 8 if ("v7" in kind or "7x" in kind) else 4


def _pick_models_per_block(M, block_bytes, requested=None):
    if requested is not None:
        mb = max(1, min(int(requested), M))
    else:
        cap = min(M, _MAX_UNROLL)
        if M >= _min_grid_blocks():
            cap = min(cap, M // _min_grid_blocks())   # keep the grid long enough
        cap = max(cap, 1)
        mb = 1
        for cand in range(1, cap + 1):
            if M % cand == 0 and block_bytes(cand) <= _BLOCK_BUDGET:
                mb = cand
    while M % mb:                    # round down to a divisor of M: no padding
        mb -= 1
    return mb


# ---------------------------------------------------------------------------
# Wrapper
# ---------------------------------------------------------------------------
def parallel_networks_forward(xs, w1, b1, w2, b2, *, models_per_block=None):
    """outs[i] = ReLU(xs[i] @ w1[i] + b1[i]) @ w2[i] + b2[i], stacked over models.

    xs: (M, B, Din); w1: (M, Din, H); b1: (M, 1, H) or (M, H);
    w2: (M, H, Dout); b2: (M, 1, Dout) or (M, Dout).
    Returns float32 (M, B, Dout).  `models_per_block` is an optional upper
    bound; it is rounded down to a divisor of M (no ragged padding copies).
    """
    M, B, Din = xs.shape
    H = w1.shape[-1]
    Dout = w2.shape[-1]
    b1 = b1.reshape(M, 1, H)
    b2 = b2.reshape(M, 1, Dout)
    out_dtype = jnp.float32           # torch reference allocates float32 `outs`

    def block_bytes(mb):
        return _block_vmem_bytes(mb, B, Din, H, Dout, w1.dtype, xs.dtype, out_dtype)

    if block_bytes(1) > _VMEM_LIMIT - 4 * 1024 * 1024:
        raise ValueError(
            f"single-model working set ({block_bytes(1)} bytes, double-buffered) "
            f"does not fit the {_VMEM_LIMIT}-byte VMEM budget; shrink the "
            "per-model shapes or raise _VMEM_LIMIT / _BLOCK_BUDGET.")

    mb = _pick_models_per_block(M, block_bytes, models_per_block)
    num_blocks = M // mb

    out = pl.pallas_call(
        _mlp_block_kernel,
        # Lane-dense output: model axis folded into the lane axis per block.
        out_shape=jax.ShapeDtypeStruct((num_blocks, B, mb * Dout), out_dtype),
        grid_spec=pltpu.PrefetchScalarGridSpec(
            num_scalar_prefetch=0,
            grid=(num_blocks,),
            in_specs=[
                pl.BlockSpec((mb, B, Din), lambda i: (i, 0, 0)),
                pl.BlockSpec((mb, Din, H), lambda i: (i, 0, 0)),
                pl.BlockSpec((mb, 1, H), lambda i: (i, 0, 0)),
                pl.BlockSpec((mb, H, Dout), lambda i: (i, 0, 0)),
                pl.BlockSpec((mb, 1, Dout), lambda i: (i, 0, 0)),
            ],
            out_specs=pl.BlockSpec((None, B, mb * Dout), lambda i: (i, 0, 0)),
        ),
        compiler_params=pltpu.CompilerParams(
            dimension_semantics=("parallel",),   # independent per-model blocks
            vmem_limit_bytes=_VMEM_LIMIT,
        ),
    )(xs, w1, b1, w2, b2)

    # Undo the lane-dense packing with cheap XLA ops on the (small) output only.
    return (out.reshape(num_blocks, B, mb, Dout)
               .transpose(0, 2, 1, 3)
               .reshape(M, B, Dout))


# ---------------------------------------------------------------------------
# Parameter init (nn.Linear-style, per model) and pure-JAX reference.
# ---------------------------------------------------------------------------
def _init_params(key, num_models, in_size, hidden, out_size):
    k1, k2, k3, k4 = jax.random.split(key, 4)
    bound1 = 1.0 / (in_size ** 0.5)
    bound2 = 1.0 / (hidden ** 0.5)
    w1 = jax.random.uniform(k1, (num_models, in_size, hidden),
                            minval=-bound1, maxval=bound1, dtype=jnp.float32)
    b1 = jax.random.uniform(k2, (num_models, 1, hidden),
                            minval=-bound1, maxval=bound1, dtype=jnp.float32)
    w2 = jax.random.uniform(k3, (num_models, hidden, out_size),
                            minval=-bound2, maxval=bound2, dtype=jnp.float32)
    b2 = jax.random.uniform(k4, (num_models, 1, out_size),
                            minval=-bound2, maxval=bound2, dtype=jnp.float32)
    return w1, b1, w2, b2


def _reference(xs, w1, b1, w2, b2):
    # High-precision ground truth; mirrors the kernel's intentional cast of
    # the ReLU output to the weight dtype before layer 2 (bf16 path).
    h = jnp.einsum("mbi,mih->mbh", xs, w1,
                   preferred_element_type=jnp.float32,
                   precision=jax.lax.Precision.HIGHEST)
    h = jnp.maximum(h + b1.astype(jnp.float32), 0.0)
    out = jnp.einsum("mbh,mho->mbo", h.astype(w2.dtype), w2,
                     preferred_element_type=jnp.float32,
                     precision=jax.lax.Precision.HIGHEST)
    return out + b2.astype(jnp.float32)


if __name__ == "__main__":
    # Small shapes: 64 tiny MLPs -> multi-block grid with a 128-lane-wide
    # output slab on v5e/v6e (mb=16) and an 8-step grid on v7x (mb=8).
    num_models, batch, in_size, hidden, out_size = 64, 8, 16, 32, 8

    key = jax.random.PRNGKey(0)
    kx, kp = jax.random.split(key)
    xs = jax.random.normal(kx, (num_models, batch, in_size), dtype=jnp.float32)
    w1, b1, w2, b2 = _init_params(kp, num_models, in_size, hidden, out_size)

    # Snap the f32 test data to bf16-representable values: first-layer MXU
    # products are then exact whether the hardware uses 1 or several bf16
    # passes for f32 operands; the tolerance below only has to cover the
    # second layer's operand rounding (deliberate default-precision MXU use —
    # the kernel is memory-bound so precision could be raised for free later).
    xs, w1, b1, w2, b2 = (a.astype(jnp.bfloat16).astype(jnp.float32)
                          for a in (xs, w1, b1, w2, b2))
    ref_f32 = _reference(xs, w1, b1, w2, b2)

    # --- f32 path, auto block size -------------------------------------------
    out_f32 = jax.block_until_ready(parallel_networks_forward(xs, w1, b1, w2, b2))
    assert out_f32.shape == (num_models, batch, out_size)
    assert out_f32.dtype == jnp.float32
    assert jnp.allclose(out_f32, ref_f32, atol=2e-2, rtol=2e-2), "f32 path mismatch"

    # --- bf16 streaming path (halved HBM traffic, f32 accumulation) ----------
    # (In production the parameters should be stored in bf16 end-to-end; the
    #  cast here only exercises the bf16 kernel path.)
    bf = jnp.bfloat16
    xs_b, w1_b, b1_b, w2_b, b2_b = (a.astype(bf) for a in (xs, w1, b1, w2, b2))
    out_bf16 = jax.block_until_ready(
        parallel_networks_forward(xs_b, w1_b, b1_b, w2_b, b2_b))
    ref_bf16 = _reference(xs_b, w1_b, b1_b, w2_b, b2_b)
    assert out_bf16.shape == (num_models, batch, out_size)
    assert out_bf16.dtype == jnp.float32
    assert jnp.allclose(out_bf16, ref_bf16, atol=2e-2, rtol=2e-2), "bf16 path mismatch"

    # --- non-divisor block request rounds down to a divisor (no padding) -----
    out_small = jax.block_until_ready(
        parallel_networks_forward(xs, w1, b1, w2, b2, models_per_block=5))
    assert jnp.allclose(out_small, ref_f32, atol=2e-2, rtol=2e-2), "small-block mismatch"

    print("KERNEL_OK")
</pallas_src>

<mosaic_0001>
module attributes {stable_mosaic.version = 11 : i64} {
  func.func @_mlp_block_kernel(%arg0: i32, %arg1: memref<16x8x16xf32, #tpu.memory_space<vmem>>, %arg2: memref<16x16x32xf32, #tpu.memory_space<vmem>>, %arg3: memref<16x1x32xf32, #tpu.memory_space<vmem>>, %arg4: memref<16x32x8xf32, #tpu.memory_space<vmem>>, %arg5: memref<16x1x8xf32, #tpu.memory_space<vmem>>, %arg6: memref<1x8x128xf32, #tpu.memory_space<vmem>>) attributes {dimension_semantics = [#tpu.dimension_semantics<parallel>], iteration_bounds = array<i64: 4>, scalar_prefetch = 0 : i64, scratch_operands = 0 : i64, tpu.core_type = #tpu.core_type<tc>, window_params = [{transform_indices = @transform_0, window_bounds = array<i64: 16, 8, 16>}, {transform_indices = @transform_1, window_bounds = array<i64: 16, 16, 32>}, {transform_indices = @transform_2, window_bounds = array<i64: 16, 1, 32>}, {transform_indices = @transform_3, window_bounds = array<i64: 16, 32, 8>}, {transform_indices = @transform_4, window_bounds = array<i64: 16, 1, 8>}, {transform_indices = @transform_5, window_bounds = array<i64: 1, 8, 128>}]} {
    %c0 = arith.constant 0 : index
    %c0_0 = arith.constant 0 : index
    %c0_1 = arith.constant 0 : index
    %0 = vector.load %arg1[%c0, %c0_0, %c0_1] : memref<16x8x16xf32, #tpu.memory_space<vmem>>, vector<1x8x16xf32>
    %1 = vector.shape_cast %0 : vector<1x8x16xf32> to vector<8x16xf32>
    %c0_2 = arith.constant 0 : index
    %c0_3 = arith.constant 0 : index
    %c0_4 = arith.constant 0 : index
    %2 = vector.load %arg2[%c0_2, %c0_3, %c0_4] : memref<16x16x32xf32, #tpu.memory_space<vmem>>, vector<1x16x32xf32>
    %3 = vector.shape_cast %2 : vector<1x16x32xf32> to vector<16x32xf32>
    %cst = arith.constant dense<0.000000e+00> : vector<8x32xf32>
    %4 = tpu.matmul %1, %3, %cst {dimension_numbers = #tpu.dot_dimension_numbers<[1], [0], [0], [1], [0, 0, 1, 1], [], []>} : vector<8x16xf32>, vector<16x32xf32>, vector<8x32xf32> -> vector<8x32xf32>
    %c0_5 = arith.constant 0 : index
    %c0_6 = arith.constant 0 : index
    %c0_7 = arith.constant 0 : index
    %5 = vector.load %arg3[%c0_5, %c0_6, %c0_7] : memref<16x1x32xf32, #tpu.memory_space<vmem>>, vector<1x1x32xf32>
    %6 = vector.shape_cast %5 : vector<1x1x32xf32> to vector<1x32xf32>
    %7 = vector.broadcast %6 : vector<1x32xf32> to vector<8x32xf32>
    %8 = arith.addf %4, %7 : vector<8x32xf32>
    %cst_8 = arith.constant 0.000000e+00 : f32
    %9 = vector.broadcast %cst_8 : f32 to vector<8x32xf32>
    %10 = arith.maximumf %8, %9 : vector<8x32xf32>
    %c0_9 = arith.constant 0 : index
    %c0_10 = arith.constant 0 : index
    %c0_11 = arith.constant 0 : index
    %11 = vector.load %arg4[%c0_9, %c0_10, %c0_11] : memref<16x32x8xf32, #tpu.memory_space<vmem>>, vector<1x32x8xf32>
    %12 = vector.shape_cast %11 : vector<1x32x8xf32> to vector<32x8xf32>
    %cst_12 = arith.constant dense<0.000000e+00> : vector<8x8xf32>
    %13 = tpu.matmul %10, %12, %cst_12 {dimension_numbers = #tpu.dot_dimension_numbers<[1], [0], [0], [1], [0, 0, 1, 1], [], []>} : vector<8x32xf32>, vector<32x8xf32>, vector<8x8xf32> -> vector<8x8xf32>
    %c0_13 = arith.constant 0 : index
    %c0_14 = arith.constant 0 : index
    %c0_15 = arith.constant 0 : index
    %14 = vector.load %arg5[%c0_13, %c0_14, %c0_15] : memref<16x1x8xf32, #tpu.memory_space<vmem>>, vector<1x1x8xf32>
    %15 = vector.shape_cast %14 : vector<1x1x8xf32> to vector<1x8xf32>
    %16 = vector.broadcast %15 : vector<1x8xf32> to vector<8x8xf32>
    %17 = arith.addf %13, %16 : vector<8x8xf32>
    %c0_16 = arith.constant 0 : index
    %c0_17 = arith.constant 0 : index
    %c0_18 = arith.constant 0 : index
    %18 = vector.load %arg6[%c0_16, %c0_17, %c0_18] : memref<1x8x128xf32, #tpu.memory_space<vmem>>, vector<1x8x8xf32>
    %19 = vector.shape_cast %18 : vector<1x8x8xf32> to vector<8x8xf32>
    %20 = vector.shape_cast %17 : vector<8x8xf32> to vector<1x8x8xf32>
    tpu.vector_store %arg6[%c0_16, %c0_17, %c0_18], %20 {strides = array<i32>} : memref<1x8x128xf32, #tpu.memory_space<vmem>>, vector<1x8x8xf32>,
    %c1 = arith.constant 1 : index
    %c0_19 = arith.constant 0 : index
    %c0_20 = arith.constant 0 : index
    %21 = vector.load %arg1[%c1, %c0_19, %c0_20] : memref<16x8x16xf32, #tpu.memory_space<vmem>>, vector<1x8x16xf32>
    %22 = vector.shape_cast %21 : vector<1x8x16xf32> to vector<8x16xf32>
    %c1_21 = arith.constant 1 : index
    %c0_22 = arith.constant 0 : index
    %c0_23 = arith.constant 0 : index
    %23 = vector.load %arg2[%c1_21, %c0_22, %c0_23] : memref<16x16x32xf32, #tpu.memory_space<vmem>>, vector<1x16x32xf32>
    %24 = vector.shape_cast %23 : vector<1x16x32xf32> to vector<16x32xf32>
    %cst_24 = arith.constant dense<0.000000e+00> : vector<8x32xf32>
    %25 = tpu.matmul %22, %24, %cst_24 {dimension_numbers = #tpu.dot_dimension_numbers<[1], [0], [0], [1], [0, 0, 1, 1], [], []>} : vector<8x16xf32>, vector<16x32xf32>, vector<8x32xf32> -> vector<8x32xf32>
    %c1_25 = arith.constant 1 : index
    %c0_26 = arith.constant 0 : index
    %c0_27 = arith.constant 0 : index
    %26 = vector.load %arg3[%c1_25, %c0_26, %c0_27] : memref<16x1x32xf32, #tpu.memory_space<vmem>>, vector<1x1x32xf32>
    %27 = vector.shape_cast %26 : vector<1x1x32xf32> to vector<1x32xf32>
    %28 = vector.broadcast %27 : vector<1x32xf32> to vector<8x32xf32>
    %29 = arith.addf %25, %28 : vector<8x32xf32>
    %cst_28 = arith.constant 0.000000e+00 : f32
    %30 = vector.broadcast %cst_28 : f32 to vector<8x32xf32>
    %31 = arith.maximumf %29, %30 : vector<8x32xf32>
    %c1_29 = arith.constant 1 : index
    %c0_30 = arith.constant 0 : index
    %c0_31 = arith.constant 0 : index
    %32 = vector.load %arg4[%c1_29, %c0_30, %c0_31] : memref<16x32x8xf32, #tpu.memory_space<vmem>>, vector<1x32x8xf32>
    %33 = vector.shape_cast %32 : vector<1x32x8xf32> to vector<32x8xf32>
    %cst_32 = arith.constant dense<0.000000e+00> : vector<8x8xf32>
    %34 = tpu.matmul %31, %33, %cst_32 {dimension_numbers = #tpu.dot_dimension_numbers<[1], [0], [0], [1], [0, 0, 1, 1], [], []>} : vector<8x32xf32>, vector<32x8xf32>, vector<8x8xf32> -> vector<8x8xf32>
    %c1_33 = arith.constant 1 : index
    %c0_34 = arith.constant 0 : index
    %c0_35 = arith.constant 0 : index
    %35 = vector.load %arg5[%c1_33, %c0_34, %c0_35] : memref<16x1x8xf32, #tpu.memory_space<vmem>>, vector<1x1x8xf32>
    %36 = vector.shape_cast %35 : vector<1x1x8xf32> to vector<1x8xf32>
    %37 = vector.broadcast %36 : vector<1x8xf32> to vector<8x8xf32>
    %38 = arith.addf %34, %37 : vector<8x8xf32>
    %c0_36 = arith.constant 0 : index
    %c0_37 = arith.constant 0 : index
    %c8 = arith.constant 8 : index
    %39 = vector.load %arg6[%c0_36, %c0_37, %c8] : memref<1x8x128xf32, #tpu.memory_space<vmem>>, vector<1x8x8xf32>
    %40 = vector.shape_cast %39 : vector<1x8x8xf32> to vector<8x8xf32>
    %41 = vector.shape_cast %38 : vector<8x8xf32> to vector<1x8x8xf32>
    tpu.vector_store %arg6[%c0_36, %c0_37, %c8], %41 {strides = array<i32>} : memref<1x8x128xf32, #tpu.memory_space<vmem>>, vector<1x8x8xf32>,
    %c2 = arith.constant 2 : index
    %c0_38 = arith.constant 0 : index
    %c0_39 = arith.constant 0 : index
    %42 = vector.load %arg1[%c2, %c0_38, %c0_39] : memref<16x8x16xf32, #tpu.memory_space<vmem>>, vector<1x8x16xf32>
    %43 = vector.shape_cast %42 : vector<1x8x16xf32> to vector<8x16xf32>
    %c2_40 = arith.constant 2 : index
    %c0_41 = arith.constant 0 : index
    %c0_42 = arith.constant 0 : index
    %44 = vector.load %arg2[%c2_40, %c0_41, %c0_42] : memref<16x16x32xf32, #tpu.memory_space<vmem>>, vector<1x16x32xf32>
    %45 = vector.shape_cast %44 : vector<1x16x32xf32> to vector<16x32xf32>
    %cst_43 = arith.constant dense<0.000000e+00> : vector<8x32xf32>
    %46 = tpu.matmul %43, %45, %cst_43 {dimension_numbers = #tpu.dot_dimension_numbers<[1], [0], [0], [1], [0, 0, 1, 1], [], []>} : vector<8x16xf32>, vector<16x32xf32>, vector<8x32xf32> -> vector<8x32xf32>
    %c2_44 = arith.constant 2 : index
    %c0_45 = arith.constant 0 : index
    %c0_46 = arith.constant 0 : index
    %47 = vector.load %arg3[%c2_44, %c0_45, %c0_46] : memref<16x1x32xf32, #tpu.memory_space<vmem>>, vector<1x1x32xf32>
    %48 = vector.shape_cast %47 : vector<1x1x32xf32> to vector<1x32xf32>
    %49 = vector.broadcast %48 : vector<1x32xf32> to vector<8x32xf32>
    %50 = arith.addf %46, %49 : vector<8x32xf32>
    %cst_47 = arith.constant 0.000000e+00 : f32
    %51 = vector.broadcast %cst_47 : f32 to vector<8x32xf32>
    %52 = arith.maximumf %50, %51 : vector<8x32xf32>
    %c2_48 = arith.constant 2 : index
    %c0_49 = arith.constant 0 : index
    %c0_50 = arith.constant 0 : index
    %53 = vector.load %arg4[%c2_48, %c0_49, %c0_50] : memref<16x32x8xf32, #tpu.memory_space<vmem>>, vector<1x32x8xf32>
    %54 = vector.shape_cast %53 : vector<1x32x8xf32> to vector<32x8xf32>
    %cst_51 = arith.constant dense<0.000000e+00> : vector<8x8xf32>
    %55 = tpu.matmul %52, %54, %cst_51 {dimension_numbers = #tpu.dot_dimension_numbers<[1], [0], [0], [1], [0, 0, 1, 1], [], []>} : vector<8x32xf32>, vector<32x8xf32>, vector<8x8xf32> -> vector<8x8xf32>
    %c2_52 = arith.constant 2 : index
    %c0_53 = arith.constant 0 : index
    %c0_54 = arith.constant 0 : index
    %56 = vector.load %arg5[%c2_52, %c0_53, %c0_54] : memref<16x1x8xf32, #tpu.memory_space<vmem>>, vector<1x1x8xf32>
    %57 = vector.shape_cast %56 : vector<1x1x8xf32> to vector<1x8xf32>
    %58 = vector.broadcast %57 : vector<1x8xf32> to vector<8x8xf32>
    %59 = arith.addf %55, %58 : vector<8x8xf32>
    %c0_55 = arith.constant 0 : index
    %c0_56 = arith.constant 0 : index
    %c16 = arith.constant 16 : index
    %60 = vector.load %arg6[%c0_55, %c0_56, %c16] : memref<1x8x128xf32, #tpu.memory_space<vmem>>, vector<1x8x8xf32>
    %61 = vector.shape_cast %60 : vector<1x8x8xf32> to vector<8x8xf32>
    %62 = vector.shape_cast %59 : vector<8x8xf32> to vector<1x8x8xf32>
    tpu.vector_store %arg6[%c0_55, %c0_56, %c16], %62 {strides = array<i32>} : memref<1x8x128xf32, #tpu.memory_space<vmem>>, vector<1x8x8xf32>,
    %c3 = arith.constant 3 : index
    %c0_57 = arith.constant 0 : index
    %c0_58 = arith.constant 0 : index
    %63 = vector.load %arg1[%c3, %c0_57, %c0_58] : memref<16x8x16xf32, #tpu.memory_space<vmem>>, vector<1x8x16xf32>
    %64 = vector.shape_cast %63 : vector<1x8x16xf32> to vector<8x16xf32>
    %c3_59 = arith.constant 3 : index
    %c0_60 = arith.constant 0 : index
    %c0_61 = arith.constant 0 : index
    %65 = vector.load %arg2[%c3_59, %c0_60, %c0_61] : memref<16x16x32xf32, #tpu.memory_space<vmem>>, vector<1x16x32xf32>
    %66 = vector.shape_cast %65 : vector<1x16x32xf32> to vector<16x32xf32>
    %cst_62 = arith.constant dense<0.000000e+00> : vector<8x32xf32>
    %67 = tpu.matmul %64, %66, %cst_62 {dimension_numbers = #tpu.dot_dimension_numbers<[1], [0], [0], [1], [0, 0, 1, 1], [], []>} : vector<8x16xf32>, vector<16x32xf32>, vector<8x32xf32> -> vector<8x32xf32>
    %c3_63 = arith.constant 3 : index
    %c0_64 = arith.constant 0 : index
    %c0_65 = arith.constant 0 : index
    %68 = vector.load %arg3[%c3_63, %c0_64, %c0_65] : memref<16x1x32xf32, #tpu.memory_space<vmem>>, vector<1x1x32xf32>
    %69 = vector.shape_cast %68 : vector<1x1x32xf32> to vector<1x32xf32>
    %70 = vector.broadcast %69 : vector<1x32xf32> to vector<8x32xf32>
    %71 = arith.addf %67, %70 : vector<8x32xf32>
    %cst_66 = arith.constant 0.000000e+00 : f32
    %72 = vector.broadcast %cst_66 : f32 to vector<8x32xf32>
    %73 = arith.maximumf %71, %72 : vector<8x32xf32>
    %c3_67 = arith.constant 3 : index
    %c0_68 = arith.constant 0 : index
    %c0_69 = arith.constant 0 : index
    %74 = vector.load %arg4[%c3_67, %c0_68, %c0_69] : memref<16x32x8xf32, #tpu.memory_space<vmem>>, vector<1x32x8xf32>
    %75 = vector.shape_cast %74 : vector<1x32x8xf32> to vector<32x8xf32>
    %cst_70 = arith.constant dense<0.000000e+00> : vector<8x8xf32>
    %76 = tpu.matmul %73, %75, %cst_70 {dimension_numbers = #tpu.dot_dimension_numbers<[1], [0], [0], [1], [0, 0, 1, 1], [], []>} : vector<8x32xf32>, vector<32x8xf32>, vector<8x8xf32> -> vector<8x8xf32>
    %c3_71 = arith.constant 3 : index
    %c0_72 = arith.constant 0 : index
    %c0_73 = arith.constant 0 : index
    %77 = vector.load %arg5[%c3_71, %c0_72, %c0_73] : memref<16x1x8xf32, #tpu.memory_space<vmem>>, vector<1x1x8xf32>
    %78 = vector.shape_cast %77 : vector<1x1x8xf32> to vector<1x8xf32>
    %79 = vector.broadcast %78 : vector<1x8xf32> to vector<8x8xf32>
    %80 = arith.addf %76, %79 : vector<8x8xf32>
    %c0_74 = arith.constant 0 : index
    %c0_75 = arith.constant 0 : index
    %c24 = arith.constant 24 : index
    %81 = vector.load %arg6[%c0_74, %c0_75, %c24] : memref<1x8x128xf32, #tpu.memory_space<vmem>>, vector<1x8x8xf32>
    %82 = vector.shape_cast %81 : vector<1x8x8xf32> to vector<8x8xf32>
    %83 = vector.shape_cast %80 : vector<8x8xf32> to vector<1x8x8xf32>
    tpu.vector_store %arg6[%c0_74, %c0_75, %c24], %83 {strides = array<i32>} : memref<1x8x128xf32, #tpu.memory_space<vmem>>, vector<1x8x8xf32>,
    %c4 = arith.constant 4 : index
    %c0_76 = arith.constant 0 : index
    %c0_77 = arith.constant 0 : index
    %84 = vector.load %arg1[%c4, %c0_76, %c0_77] : memref<16x8x16xf32, #tpu.memory_space<vmem>>, vector<1x8x16xf32>
    %85 = vector.shape_cast %84 : vector<1x8x16xf32> to vector<8x16xf32>
    %c4_78 = arith.constant 4 : index
    %c0_79 = arith.constant 0 : index
    %c0_80 = arith.constant 0 : index
    %86 = vector.load %arg2[%c4_78, %c0_79, %c0_80] : memref<16x16x32xf32, #tpu.memory_space<vmem>>, vector<1x16x32xf32>
    %87 = vector.shape_cast %86 : vector<1x16x32xf32> to vector<16x32xf32>
    %cst_81 = arith.constant dense<0.000000e+00> : vector<8x32xf32>
    %88 = tpu.matmul %85, %87, %cst_81 {dimension_numbers = #tpu.dot_dimension_numbers<[1], [0], [0], [1], [0, 0, 1, 1], [], []>} : vector<8x16xf32>, vector<16x32xf32>, vector<8x32xf32> -> vector<8x32xf32>
    %c4_82 = arith.constant 4 : index
    %c0_83 = arith.constant 0 : index
    %c0_84 = arith.constant 0 : index
    %89 = vector.load %arg3[%c4_82, %c0_83, %c0_84] : memref<16x1x32xf32, #tpu.memory_space<vmem>>, vector<1x1x32xf32>
    %90 = vector.shape_cast %89 : vector<1x1x32xf32> to vector<1x32xf32>
    %91 = vector.broadcast %90 : vector<1x32xf32> to vector<8x32xf32>
    %92 = arith.addf %88, %91 : vector<8x32xf32>
    %cst_85 = arith.constant 0.000000e+00 : f32
    %93 = vector.broadcast %cst_85 : f32 to vector<8x32xf32>
    %94 = arith.maximumf %92, %93 : vector<8x32xf32>
    %c4_86 = arith.constant 4 : index
    %c0_87 = arith.constant 0 : index
    %c0_88 = arith.constant 0 : index
    %95 = vector.load %arg4[%c4_86, %c0_87, %c0_88] : memref<16x32x8xf32, #tpu.memory_space<vmem>>, vector<1x32x8xf32>
    %96 = vector.shape_cast %95 : vector<1x32x8xf32> to vector<32x8xf32>
    %cst_89 = arith.constant dense<0.000000e+00> : vector<8x8xf32>
    %97 = tpu.matmul %94, %96, %cst_89 {dimension_numbers = #tpu.dot_dimension_numbers<[1], [0], [0], [1], [0, 0, 1, 1], [], []>} : vector<8x32xf32>, vector<32x8xf32>, vector<8x8xf32> -> vector<8x8xf32>
    %c4_90 = arith.constant 4 : index
    %c0_91 = arith.constant 0 : index
    %c0_92 = arith.constant 0 : index
    %98 = vector.load %arg5[%c4_90, %c0_91, %c0_92] : memref<16x1x8xf32, #tpu.memory_space<vmem>>, vector<1x1x8xf32>
    %99 = vector.shape_cast %98 : vector<1x1x8xf32> to vector<1x8xf32>
    %100 = vector.broadcast %99 : vector<1x8xf32> to vector<8x8xf32>
    %101 = arith.addf %97, %100 : vector<8x8xf32>
    %c0_93 = arith.constant 0 : index
    %c0_94 = arith.constant 0 : index
    %c32 = arith.constant 32 : index
    %102 = vector.load %arg6[%c0_93, %c0_94, %c32] : memref<1x8x128xf32, #tpu.memory_space<vmem>>, vector<1x8x8xf32>
    %103 = vector.shape_cast %102 : vector<1x8x8xf32> to vector<8x8xf32>
    %104 = vector.shape_cast %101 : vector<8x8xf32> to vector<1x8x8xf32>
    tpu.vector_store %arg6[%c0_93, %c0_94, %c32], %104 {strides = array<i32>} : memref<1x8x128xf32, #tpu.memory_space<vmem>>, vector<1x8x8xf32>,
    %c5 = arith.constant 5 : index
    %c0_95 = arith.constant 0 : index
    %c0_96 = arith.constant 0 : index
    %105 = vector.load %arg1[%c5, %c0_95, %c0_96] : memref<16x8x16xf32, #tpu.memory_space<vmem>>, vector<1x8x16xf32>
    %106 = vector.shape_cast %105 : vector<1x8x16xf32> to vector<8x16xf32>
    %c5_97 = arith.constant 5 : index
    %c0_98 = arith.constant 0 : index
    %c0_99 = arith.constant 0 : index
    %107 = vector.load %arg2[%c5_97, %c0_98, %c0_99] : memref<16x16x32xf32, #tpu.memory_space<vmem>>, vector<1x16x32xf32>
    %108 = vector.shape_cast %107 : vector<1x16x32xf32> to vector<16x32xf32>
    %cst_100 = arith.constant dense<0.000000e+00> : vector<8x32xf32>
    %109 = tpu.matmul %106, %108, %cst_100 {dimension_numbers = #tpu.dot_dimension_numbers<[1], [0], [0], [1], [0, 0, 1, 1], [], []>} : vector<8x16xf32>, vector<16x32xf32>, vector<8x32xf32> -> vector<8x32xf32>
    %c5_101 = arith.constant 5 : index
    %c0_102 = arith.constant 0 : index
    %c0_103 = arith.constant 0 : index
    %110 = vector.load %arg3[%c5_101, %c0_102, %c0_103] : memref<16x1x32xf32, #tpu.memory_space<vmem>>, vector<1x1x32xf32>
    %111 = vector.shape_cast %110 : vector<1x1x32xf32> to vector<1x32xf32>
    %112 = vector.broadcast %111 : vector<1x32xf32> to vector<8x32xf32>
    %113 = arith.addf %109, %112 : vector<8x32xf32>
    %cst_104 = arith.constant 0.000000e+00 : f32
    %114 = vector.broadcast %cst_104 : f32 to vector<8x32xf32>
    %115 = arith.maximumf %113, %114 : vector<8x32xf32>
    %c5_105 = arith.constant 5 : index
    %c0_106 = arith.constant 0 : index
    %c0_107 = arith.constant 0 : index
    %116 = vector.load %arg4[%c5_105, %c0_106, %c0_107] : memref<16x32x8xf32, #tpu.memory_space<vmem>>, vector<1x32x8xf32>
    %117 = vector.shape_cast %116 : vector<1x32x8xf32> to vector<32x8xf32>
    %cst_108 = arith.constant dense<0.000000e+00> : vector<8x8xf32>
    %118 = tpu.matmul %115, %117, %cst_108 {dimension_numbers = #tpu.dot_dimension_numbers<[1], [0], [0], [1], [0, 0, 1, 1], [], []>} : vector<8x32xf32>, vector<32x8xf32>, vector<8x8xf32> -> vector<8x8xf32>
    %c5_109 = arith.constant 5 : index
    %c0_110 = arith.constant 0 : index
    %c0_111 = arith.constant 0 : index
    %119 = vector.load %arg5[%c5_109, %c0_110, %c0_111] : memref<16x1x8xf32, #tpu.memory_space<vmem>>, vector<1x1x8xf32>
    %120 = vector.shape_cast %119 : vector<1x1x8xf32> to vector<1x8xf32>
    %121 = vector.broadcast %120 : vector<1x8xf32> to vector<8x8xf32>
    %122 = arith.addf %118, %121 : vector<8x8xf32>
    %c0_112 = arith.constant 0 : index
    %c0_113 = arith.constant 0 : index
    %c40 = arith.constant 40 : index
    %123 = vector.load %arg6[%c0_112, %c0_113, %c40] : memref<1x8x128xf32, #tpu.memory_space<vmem>>, vector<1x8x8xf32>
    %124 = vector.shape_cast %123 : vector<1x8x8xf32> to vector<8x8xf32>
    %125 = vector.shape_cast %122 : vector<8x8xf32> to vector<1x8x8xf32>
    tpu.vector_store %arg6[%c0_112, %c0_113, %c40], %125 {strides = array<i32>} : memref<1x8x128xf32, #tpu.memory_space<vmem>>, vector<1x8x8xf32>,
    %c6 = arith.constant 6 : index
    %c0_114 = arith.constant 0 : index
    %c0_115 = arith.constant 0 : index
    %126 = vector.load %arg1[%c6, %c0_114, %c0_115] : memref<16x8x16xf32, #tpu.memory_space<vmem>>, vector<1x8x16xf32>
    %127 = vector.shape_cast %126 : vector<1x8x16xf32> to vector<8x16xf32>
    %c6_116 = arith.constant 6 : index
    %c0_117 = arith.constant 0 : index
    %c0_118 = arith.constant 0 : index
    %128 = vector.load %arg2[%c6_116, %c0_117, %c0_118] : memref<16x16x32xf32, #tpu.memory_space<vmem>>, vector<1x16x32xf32>
    %129 = vector.shape_cast %128 : vector<1x16x32xf32> to vector<16x32xf32>
    %cst_119 = arith.constant dense<0.000000e+00> : vector<8x32xf32>
    %130 = tpu.matmul %127, %129, %cst_119 {dimension_numbers = #tpu.dot_dimension_numbers<[1], [0], [0], [1], [0, 0, 1, 1], [], []>} : vector<8x16xf32>, vector<16x32xf32>, vector<8x32xf32> -> vector<8x32xf32>
    %c6_120 = arith.constant 6 : index
    %c0_121 = arith.constant 0 : index
    %c0_122 = arith.constant 0 : index
    %131 = vector.load %arg3[%c6_120, %c0_121, %c0_122] : memref<16x1x32xf32, #tpu.memory_space<vmem>>, vector<1x1x32xf32>
    %132 = vector.shape_cast %131 : vector<1x1x32xf32> to vector<1x32xf32>
    %133 = vector.broadcast %132 : vector<1x32xf32> to vector<8x32xf32>
    %134 = arith.addf %130, %133 : vector<8x32xf32>
    %cst_123 = arith.constant 0.000000e+00 : f32
    %135 = vector.broadcast %cst_123 : f32 to vector<8x32xf32>
    %136 = arith.maximumf %134, %135 : vector<8x32xf32>
    %c6_124 = arith.constant 6 : index
    %c0_125 = arith.constant 0 : index
    %c0_126 = arith.constant 0 : index
    %137 = vector.load %arg4[%c6_124, %c0_125, %c0_126] : memref<16x32x8xf32, #tpu.memory_space<vmem>>, vector<1x32x8xf32>
    %138 = vector.shape_cast %137 : vector<1x32x8xf32> to vector<32x8xf32>
    %cst_127 = arith.constant dense<0.000000e+00> : vector<8x8xf32>
    %139 = tpu.matmul %136, %138, %cst_127 {dimension_numbers = #tpu.dot_dimension_numbers<[1], [0], [0], [1], [0, 0, 1, 1], [], []>} : vector<8x32xf32>, vector<32x8xf32>, vector<8x8xf32> -> vector<8x8xf32>
    %c6_128 = arith.constant 6 : index
    %c0_129 = arith.constant 0 : index
    %c0_130 = arith.constant 0 : index
    %140 = vector.load %arg5[%c6_128, %c0_129, %c0_130] : memref<16x1x8xf32, #tpu.memory_space<vmem>>, vector<1x1x8xf32>
    %141 = vector.shape_cast %140 : vector<1x1x8xf32> to vector<1x8xf32>
    %142 = vector.broadcast %141 : vector<1x8xf32> to vector<8x8xf32>
    %143 = arith.addf %139, %142 : vector<8x8xf32>
    %c0_131 = arith.constant 0 : index
    %c0_132 = arith.constant 0 : index
    %c48 = arith.constant 48 : index
    %144 = vector.load %arg6[%c0_131, %c0_132, %c48] : memref<1x8x128xf32, #tpu.memory_space<vmem>>, vector<1x8x8xf32>
    %145 = vector.shape_cast %144 : vector<1x8x8xf32> to vector<8x8xf32>
    %146 = vector.shape_cast %143 : vector<8x8xf32> to vector<1x8x8xf32>
    tpu.vector_store %arg6[%c0_131, %c0_132, %c48], %146 {strides = array<i32>} : memref<1x8x128xf32, #tpu.memory_space<vmem>>, vector<1x8x8xf32>,
    %c7 = arith.constant 7 : index
    %c0_133 = arith.constant 0 : index
    %c0_134 = arith.constant 0 : index
    %147 = vector.load %arg1[%c7, %c0_133, %c0_134] : memref<16x8x16xf32, #tpu.memory_space<vmem>>, vector<1x8x16xf32>
    %148 = vector.shape_cast %147 : vector<1x8x16xf32> to vector<8x16xf32>
    %c7_135 = arith.constant 7 : index
    %c0_136 = arith.constant 0 : index
    %c0_137 = arith.constant 0 : index
    %149 = vector.load %arg2[%c7_135, %c0_136, %c0_137] : memref<16x16x32xf32, #tpu.memory_space<vmem>>, vector<1x16x32xf32>
    %150 = vector.shape_cast %149 : vector<1x16x32xf32> to vector<16x32xf32>
    %cst_138 = arith.constant dense<0.000000e+00> : vector<8x32xf32>
    %151 = tpu.matmul %148, %150, %cst_138 {dimension_numbers = #tpu.dot_dimension_numbers<[1], [0], [0], [1], [0, 0, 1, 1], [], []>} : vector<8x16xf32>, vector<16x32xf32>, vector<8x32xf32> -> vector<8x32xf32>
    %c7_139 = arith.constant 7 : index
    %c0_140 = arith.constant 0 : index
    %c0_141 = arith.constant 0 : index
    %152 = vector.load %arg3[%c7_139, %c0_140, %c0_141] : memref<16x1x32xf32, #tpu.memory_space<vmem>>, vector<1x1x32xf32>
    %153 = vector.shape_cast %152 : vector<1x1x32xf32> to vector<1x32xf32>
    %154 = vector.broadcast %153 : vector<1x32xf32> to vector<8x32xf32>
    %155 = arith.addf %151, %154 : vector<8x32xf32>
    %cst_142 = arith.constant 0.000000e+00 : f32
    %156 = vector.broadcast %cst_142 : f32 to vector<8x32xf32>
    %157 = arith.maximumf %155, %156 : vector<8x32xf32>
    %c7_143 = arith.constant 7 : index
    %c0_144 = arith.constant 0 : index
    %c0_145 = arith.constant 0 : index
    %158 = vector.load %arg4[%c7_143, %c0_144, %c0_145] : memref<16x32x8xf32, #tpu.memory_space<vmem>>, vector<1x32x8xf32>
    %159 = vector.shape_cast %158 : vector<1x32x8xf32> to vector<32x8xf32>
    %cst_146 = arith.constant dense<0.000000e+00> : vector<8x8xf32>
    %160 = tpu.matmul %157, %159, %cst_146 {dimension_numbers = #tpu.dot_dimension_numbers<[1], [0], [0], [1], [0, 0, 1, 1], [], []>} : vector<8x32xf32>, vector<32x8xf32>, vector<8x8xf32> -> vector<8x8xf32>
    %c7_147 = arith.constant 7 : index
    %c0_148 = arith.constant 0 : index
    %c0_149 = arith.constant 0 : index
    %161 = vector.load %arg5[%c7_147, %c0_148, %c0_149] : memref<16x1x8xf32, #tpu.memory_space<vmem>>, vector<1x1x8xf32>
    %162 = vector.shape_cast %161 : vector<1x1x8xf32> to vector<1x8xf32>
    %163 = vector.broadcast %162 : vector<1x8xf32> to vector<8x8xf32>
    %164 = arith.addf %160, %163 : vector<8x8xf32>
    %c0_150 = arith.constant 0 : index
    %c0_151 = arith.constant 0 : index
    %c56 = arith.constant 56 : index
    %165 = vector.load %arg6[%c0_150, %c0_151, %c56] : memref<1x8x128xf32, #tpu.memory_space<vmem>>, vector<1x8x8xf32>
    %166 = vector.shape_cast %165 : vector<1x8x8xf32> to vector<8x8xf32>
    %167 = vector.shape_cast %164 : vector<8x8xf32> to vector<1x8x8xf32>
    tpu.vector_store %arg6[%c0_150, %c0_151, %c56], %167 {strides = array<i32>} : memref<1x8x128xf32, #tpu.memory_space<vmem>>, vector<1x8x8xf32>,
    %c8_152 = arith.constant 8 : index
    %c0_153 = arith.constant 0 : index
    %c0_154 = arith.constant 0 : index
    %168 = vector.load %arg1[%c8_152, %c0_153, %c0_154] : memref<16x8x16xf32, #tpu.memory_space<vmem>>, vector<1x8x16xf32>
    %169 = vector.shape_cast %168 : vector<1x8x16xf32> to vector<8x16xf32>
    %c8_155 = arith.constant 8 : index
    %c0_156 = arith.constant 0 : index
    %c0_157 = arith.constant 0 : index
    %170 = vector.load %arg2[%c8_155, %c0_156, %c0_157] : memref<16x16x32xf32, #tpu.memory_space<vmem>>, vector<1x16x32xf32>
    %171 = vector.shape_cast %170 : vector<1x16x32xf32> to vector<16x32xf32>
    %cst_158 = arith.constant dense<0.000000e+00> : vector<8x32xf32>
    %172 = tpu.matmul %169, %171, %cst_158 {dimension_numbers = #tpu.dot_dimension_numbers<[1], [0], [0], [1], [0, 0, 1, 1], [], []>} : vector<8x16xf32>, vector<16x32xf32>, vector<8x32xf32> -> vector<8x32xf32>
    %c8_159 = arith.constant 8 : index
    %c0_160 = arith.constant 0 : index
    %c0_161 = arith.constant 0 : index
    %173 = vector.load %arg3[%c8_159, %c0_160, %c0_161] : memref<16x1x32xf32, #tpu.memory_space<vmem>>, vector<1x1x32xf32>
    %174 = vector.shape_cast %173 : vector<1x1x32xf32> to vector<1x32xf32>
    %175 = vector.broadcast %174 : vector<1x32xf32> to vector<8x32xf32>
    %176 = arith.addf %172, %175 : vector<8x32xf32>
    %cst_162 = arith.constant 0.000000e+00 : f32
    %177 = vector.broadcast %cst_162 : f32 to vector<8x32xf32>
    %178 = arith.maximumf %176, %177 : vector<8x32xf32>
    %c8_163 = arith.constant 8 : index
    %c0_164 = arith.constant 0 : index
    %c0_165 = arith.constant 0 : index
    %179 = vector.load %arg4[%c8_163, %c0_164, %c0_165] : memref<16x32x8xf32, #tpu.memory_space<vmem>>, vector<1x32x8xf32>
    %180 = vector.shape_cast %179 : vector<1x32x8xf32> to vector<32x8xf32>
    %cst_166 = arith.constant dense<0.000000e+00> : vector<8x8xf32>
    %181 = tpu.matmul %178, %180, %cst_166 {dimension_numbers = #tpu.dot_dimension_numbers<[1], [0], [0], [1], [0, 0, 1, 1], [], []>} : vector<8x32xf32>, vector<32x8xf32>, vector<8x8xf32> -> vector<8x8xf32>
    %c8_167 = arith.constant 8 : index
    %c0_168 = arith.constant 0 : index
    %c0_169 = arith.constant 0 : index
    %182 = vector.load %arg5[%c8_167, %c0_168, %c0_169] : memref<16x1x8xf32, #tpu.memory_space<vmem>>, vector<1x1x8xf32>
    %183 = vector.shape_cast %182 : vector<1x1x8xf32> to vector<1x8xf32>
    %184 = vector.broadcast %183 : vector<1x8xf32> to vector<8x8xf32>
    %185 = arith.addf %181, %184 : vector<8x8xf32>
    %c0_170 = arith.constant 0 : index
    %c0_171 = arith.constant 0 : index
    %c64 = arith.constant 64 : index
    %186 = vector.load %arg6[%c0_170, %c0_171, %c64] : memref<1x8x128xf32, #tpu.memory_space<vmem>>, vector<1x8x8xf32>
    %187 = vector.shape_cast %186 : vector<1x8x8xf32> to vector<8x8xf32>
    %188 = vector.shape_cast %185 : vector<8x8xf32> to vector<1x8x8xf32>
    tpu.vector_store %arg6[%c0_170, %c0_171, %c64], %188 {strides = array<i32>} : memref<1x8x128xf32, #tpu.memory_space<vmem>>, vector<1x8x8xf32>,
    %c9 = arith.constant 9 : index
    %c0_172 = arith.constant 0 : index
    %c0_173 = arith.constant 0 : index
    %189 = vector.load %arg1[%c9, %c0_172, %c0_173] : memref<16x8x16xf32, #tpu.memory_space<vmem>>, vector<1x8x16xf32>
    %190 = vector.shape_cast %189 : vector<1x8x16xf32> to vector<8x16xf32>
    %c9_174 = arith.constant 9 : index
    %c0_175 = arith.constant 0 : index
    %c0_176 = arith.constant 0 : index
    %191 = vector.load %arg2[%c9_174, %c0_175, %c0_176] : memref<16x16x32xf32, #tpu.memory_space<vmem>>, vector<1x16x32xf32>
    %192 = vector.shape_cast %191 : vector<1x16x32xf32> to vector<16x32xf32>
    %cst_177 = arith.constant dense<0.000000e+00> : vector<8x32xf32>
    %193 = tpu.matmul %190, %192, %cst_177 {dimension_numbers = #tpu.dot_dimension_numbers<[1], [0], [0], [1], [0, 0, 1, 1], [], []>} : vector<8x16xf32>, vector<16x32xf32>, vector<8x32xf32> -> vector<8x32xf32>
    %c9_178 = arith.constant 9 : index
    %c0_179 = arith.constant 0 : index
    %c0_180 = arith.constant 0 : index
    %194 = vector.load %arg3[%c9_178, %c0_179, %c0_180] : memref<16x1x32xf32, #tpu.memory_space<vmem>>, vector<1x1x32xf32>
    %195 = vector.shape_cast %194 : vector<1x1x32xf32> to vector<1x32xf32>
    %196 = vector.broadcast %195 : vector<1x32xf32> to vector<8x32xf32>
    %197 = arith.addf %193, %196 : vector<8x32xf32>
    %cst_181 = arith.constant 0.000000e+00 : f32
    %198 = vector.broadcast %cst_181 : f32 to vector<8x32xf32>
    %199 = arith.maximumf %197, %198 : vector<8x32xf32>
    %c9_182 = arith.constant 9 : index
    %c0_183 = arith.constant 0 : index
    %c0_184 = arith.constant 0 : index
    %200 = vector.load %arg4[%c9_182, %c0_183, %c0_184] : memref<16x32x8xf32, #tpu.memory_space<vmem>>, vector<1x32x8xf32>
    %201 = vector.shape_cast %200 : vector<1x32x8xf32> to vector<32x8xf32>
    %cst_185 = arith.constant dense<0.000000e+00> : vector<8x8xf32>
    %202 = tpu.matmul %199, %201, %cst_185 {dimension_numbers = #tpu.dot_dimension_numbers<[1], [0], [0], [1], [0, 0, 1, 1], [], []>} : vector<8x32xf32>, vector<32x8xf32>, vector<8x8xf32> -> vector<8x8xf32>
    %c9_186 = arith.constant 9 : index
    %c0_187 = arith.constant 0 : index
    %c0_188 = arith.constant 0 : index
    %203 = vector.load %arg5[%c9_186, %c0_187, %c0_188] : memref<16x1x8xf32, #tpu.memory_space<vmem>>, vector<1x1x8xf32>
    %204 = vector.shape_cast %203 : vector<1x1x8xf32> to vector<1x8xf32>
    %205 = vector.broadcast %204 : vector<1x8xf32> to vector<8x8xf32>
    %206 = arith.addf %202, %205 : vector<8x8xf32>
    %c0_189 = arith.constant 0 : index
    %c0_190 = arith.constant 0 : index
    %c72 = arith.constant 72 : index
    %207 = vector.load %arg6[%c0_189, %c0_190, %c72] : memref<1x8x128xf32, #tpu.memory_space<vmem>>, vector<1x8x8xf32>
    %208 = vector.shape_cast %207 : vector<1x8x8xf32> to vector<8x8xf32>
    %209 = vector.shape_cast %206 : vector<8x8xf32> to vector<1x8x8xf32>
    tpu.vector_store %arg6[%c0_189, %c0_190, %c72], %209 {strides = array<i32>} : memref<1x8x128xf32, #tpu.memory_space<vmem>>, vector<1x8x8xf32>,
    %c10 = arith.constant 10 : index
    %c0_191 = arith.constant 0 : index
    %c0_192 = arith.constant 0 : index
    %210 = vector.load %arg1[%c10, %c0_191, %c0_192] : memref<16x8x16xf32, #tpu.memory_space<vmem>>, vector<1x8x16xf32>
    %211 = vector.shape_cast %210 : vector<1x8x16xf32> to vector<8x16xf32>
    %c10_193 = arith.constant 10 : index
    %c0_194 = arith.constant 0 : index
    %c0_195 = arith.constant 0 : index
    %212 = vector.load %arg2[%c10_193, %c0_194, %c0_195] : memref<16x16x32xf32, #tpu.memory_space<vmem>>, vector<1x16x32xf32>
    %213 = vector.shape_cast %212 : vector<1x16x32xf32> to vector<16x32xf32>
    %cst_196 = arith.constant dense<0.000000e+00> : vector<8x32xf32>
    %214 = tpu.matmul %211, %213, %cst_196 {dimension_numbers = #tpu.dot_dimension_numbers<[1], [0], [0], [1], [0, 0, 1, 1], [], []>} : vector<8x16xf32>, vector<16x32xf32>, vector<8x32xf32> -> vector<8x32xf32>
    %c10_197 = arith.constant 10 : index
    %c0_198 = arith.constant 0 : index
    %c0_199 = arith.constant 0 : index
    %215 = vector.load %arg3[%c10_197, %c0_198, %c0_199] : memref<16x1x32xf32, #tpu.memory_space<vmem>>, vector<1x1x32xf32>
    %216 = vector.shape_cast %215 : vector<1x1x32xf32> to vector<1x32xf32>
    %217 = vector.broadcast %216 : vector<1x32xf32> to vector<8x32xf32>
    %218 = arith.addf %214, %217 : vector<8x32xf32>
    %cst_200 = arith.constant 0.000000e+00 : f32
    %219 = vector.broadcast %cst_200 : f32 to vector<8x32xf32>
    %220 = arith.maximumf %218, %219 : vector<8x32xf32>
    %c10_201 = arith.constant 10 : index
    %c0_202 = arith.constant 0 : index
    %c0_203 = arith.constant 0 : index
    %221 = vector.load %arg4[%c10_201, %c0_202, %c0_203] : memref<16x32x8xf32, #tpu.memory_space<vmem>>, vector<1x32x8xf32>
    %222 = vector.shape_cast %221 : vector<1x32x8xf32> to vector<32x8xf32>
    %cst_204 = arith.constant dense<0.000000e+00> : vector<8x8xf32>
    %223 = tpu.matmul %220, %222, %cst_204 {dimension_numbers = #tpu.dot_dimension_numbers<[1], [0], [0], [1], [0, 0, 1, 1], [], []>} : vector<8x32xf32>, vector<32x8xf32>, vector<8x8xf32> -> vector<8x8xf32>
    %c10_205 = arith.constant 10 : index
    %c0_206 = arith.constant 0 : index
    %c0_207 = arith.constant 0 : index
    %224 = vector.load %arg5[%c10_205, %c0_206, %c0_207] : memref<16x1x8xf32, #tpu.memory_space<vmem>>, vector<1x1x8xf32>
    %225 = vector.shape_cast %224 : vector<1x1x8xf32> to vector<1x8xf32>
    %226 = vector.broadcast %225 : vector<1x8xf32> to vector<8x8xf32>
    %227 = arith.addf %223, %226 : vector<8x8xf32>
    %c0_208 = arith.constant 0 : index
    %c0_209 = arith.constant 0 : index
    %c80 = arith.constant 80 : index
    %228 = vector.load %arg6[%c0_208, %c0_209, %c80] : memref<1x8x128xf32, #tpu.memory_space<vmem>>, vector<1x8x8xf32>
    %229 = vector.shape_cast %228 : vector<1x8x8xf32> to vector<8x8xf32>
    %230 = vector.shape_cast %227 : vector<8x8xf32> to vector<1x8x8xf32>
    tpu.vector_store %arg6[%c0_208, %c0_209, %c80], %230 {strides = array<i32>} : memref<1x8x128xf32, #tpu.memory_space<vmem>>, vector<1x8x8xf32>,
    %c11 = arith.constant 11 : index
    %c0_210 = arith.constant 0 : index
    %c0_211 = arith.constant 0 : index
    %231 = vector.load %arg1[%c11, %c0_210, %c0_211] : memref<16x8x16xf32, #tpu.memory_space<vmem>>, vector<1x8x16xf32>
    %232 = vector.shape_cast %231 : vector<1x8x16xf32> to vector<8x16xf32>
    %c11_212 = arith.constant 11 : index
    %c0_213 = arith.constant 0 : index
    %c0_214 = arith.constant 0 : index
    %233 = vector.load %arg2[%c11_212, %c0_213, %c0_214] : memref<16x16x32xf32, #tpu.memory_space<vmem>>, vector<1x16x32xf32>
    %234 = vector.shape_cast %233 : vector<1x16x32xf32> to vector<16x32xf32>
    %cst_215 = arith.constant dense<0.000000e+00> : vector<8x32xf32>
    %235 = tpu.matmul %232, %234, %cst_215 {dimension_numbers = #tpu.dot_dimension_numbers<[1], [0], [0], [1], [0, 0, 1, 1], [], []>} : vector<8x16xf32>, vector<16x32xf32>, vector<8x32xf32> -> vector<8x32xf32>
    %c11_216 = arith.constant 11 : index
    %c0_217 = arith.constant 0 : index
    %c0_218 = arith.constant 0 : index
    %236 = vector.load %arg3[%c11_216, %c0_217, %c0_218] : memref<16x1x32xf32, #tpu.memory_space<vmem>>, vector<1x1x32xf32>
    %237 = vector.shape_cast %236 : vector<1x1x32xf32> to vector<1x32xf32>
    %238 = vector.broadcast %237 : vector<1x32xf32> to vector<8x32xf32>
    %239 = arith.addf %235, %238 : vector<8x32xf32>
    %cst_219 = arith.constant 0.000000e+00 : f32
    %240 = vector.broadcast %cst_219 : f32 to vector<8x32xf32>
    %241 = arith.maximumf %239, %240 : vector<8x32xf32>
    %c11_220 = arith.constant 11 : index
    %c0_221 = arith.constant 0 : index
    %c0_222 = arith.constant 0 : index
    %242 = vector.load %arg4[%c11_220, %c0_221, %c0_222] : memref<16x32x8xf32, #tpu.memory_space<vmem>>, vector<1x32x8xf32>
    %243 = vector.shape_cast %242 : vector<1x32x8xf32> to vector<32x8xf32>
    %cst_223 = arith.constant dense<0.000000e+00> : vector<8x8xf32>
    %244 = tpu.matmul %241, %243, %cst_223 {dimension_numbers = #tpu.dot_dimension_numbers<[1], [0], [0], [1], [0, 0, 1, 1], [], []>} : vector<8x32xf32>, vector<32x8xf32>, vector<8x8xf32> -> vector<8x8xf32>
    %c11_224 = arith.constant 11 : index
    %c0_225 = arith.constant 0 : index
    %c0_226 = arith.constant 0 : index
    %245 = vector.load %arg5[%c11_224, %c0_225, %c0_226] : memref<16x1x8xf32, #tpu.memory_space<vmem>>, vector<1x1x8xf32>
    %246 = vector.shape_cast %245 : vector<1x1x8xf32> to vector<1x8xf32>
    %247 = vector.broadcast %246 : vector<1x8xf32> to vector<8x8xf32>
    %248 = arith.addf %244, %247 : vector<8x8xf32>
    %c0_227 = arith.constant 0 : index
    %c0_228 = arith.constant 0 : index
    %c88 = arith.constant 88 : index
    %249 = vector.load %arg6[%c0_227, %c0_228, %c88] : memref<1x8x128xf32, #tpu.memory_space<vmem>>, vector<1x8x8xf32>
    %250 = vector.shape_cast %249 : vector<1x8x8xf32> to vector<8x8xf32>
    %251 = vector.shape_cast %248 : vector<8x8xf32> to vector<1x8x8xf32>
    tpu.vector_store %arg6[%c0_227, %c0_228, %c88], %251 {strides = array<i32>} : memref<1x8x128xf32, #tpu.memory_space<vmem>>, vector<1x8x8xf32>,
    %c12 = arith.constant 12 : index
    %c0_229 = arith.constant 0 : index
    %c0_230 = arith.constant 0 : index
    %252 = vector.load %arg1[%c12, %c0_229, %c0_230] : memref<16x8x16xf32, #tpu.memory_space<vmem>>, vector<1x8x16xf32>
    %253 = vector.shape_cast %252 : vector<1x8x16xf32> to vector<8x16xf32>
    %c12_231 = arith.constant 12 : index
    %c0_232 = arith.constant 0 : index
    %c0_233 = arith.constant 0 : index
    %254 = vector.load %arg2[%c12_231, %c0_232, %c0_233] : memref<16x16x32xf32, #tpu.memory_space<vmem>>, vector<1x16x32xf32>
    %255 = vector.shape_cast %254 : vector<1x16x32xf32> to vector<16x32xf32>
    %cst_234 = arith.constant dense<0.000000e+00> : vector<8x32xf32>
    %256 = tpu.matmul %253, %255, %cst_234 {dimension_numbers = #tpu.dot_dimension_numbers<[1], [0], [0], [1], [0, 0, 1, 1], [], []>} : vector<8x16xf32>, vector<16x32xf32>, vector<8x32xf32> -> vector<8x32xf32>
    %c12_235 = arith.constant 12 : index
    %c0_236 = arith.constant 0 : index
    %c0_237 = arith.constant 0 : index
    %257 = vector.load %arg3[%c12_235, %c0_236, %c0_237] : memref<16x1x32xf32, #tpu.memory_space<vmem>>, vector<1x1x32xf32>
    %258 = vector.shape_cast %257 : vector<1x1x32xf32> to vector<1x32xf32>
    %259 = vector.broadcast %258 : vector<1x32xf32> to vector<8x32xf32>
    %260 = arith.addf %256, %259 : vector<8x32xf32>
    %cst_238 = arith.constant 0.000000e+00 : f32
    %261 = vector.broadcast %cst_238 : f32 to vector<8x32xf32>
    %262 = arith.maximumf %260, %261 : vector<8x32xf32>
    %c12_239 = arith.constant 12 : index
    %c0_240 = arith.constant 0 : index
    %c0_241 = arith.constant 0 : index
    %263 = vector.load %arg4[%c12_239, %c0_240, %c0_241] : memref<16x32x8xf32, #tpu.memory_space<vmem>>, vector<1x32x8xf32>
    %264 = vector.shape_cast %263 : vector<1x32x8xf32> to vector<32x8xf32>
    %cst_242 = arith.constant dense<0.000000e+00> : vector<8x8xf32>
    %265 = tpu.matmul %262, %264, %cst_242 {dimension_numbers = #tpu.dot_dimension_numbers<[1], [0], [0], [1], [0, 0, 1, 1], [], []>} : vector<8x32xf32>, vector<32x8xf32>, vector<8x8xf32> -> vector<8x8xf32>
    %c12_243 = arith.constant 12 : index
    %c0_244 = arith.constant 0 : index
    %c0_245 = arith.constant 0 : index
    %266 = vector.load %arg5[%c12_243, %c0_244, %c0_245] : memref<16x1x8xf32, #tpu.memory_space<vmem>>, vector<1x1x8xf32>
    %267 = vector.shape_cast %266 : vector<1x1x8xf32> to vector<1x8xf32>
    %268 = vector.broadcast %267 : vector<1x8xf32> to vector<8x8xf32>
    %269 = arith.addf %265, %268 : vector<8x8xf32>
    %c0_246 = arith.constant 0 : index
    %c0_247 = arith.constant 0 : index
    %c96 = arith.constant 96 : index
    %270 = vector.load %arg6[%c0_246, %c0_247, %c96] : memref<1x8x128xf32, #tpu.memory_space<vmem>>, vector<1x8x8xf32>
    %271 = vector.shape_cast %270 : vector<1x8x8xf32> to vector<8x8xf32>
    %272 = vector.shape_cast %269 : vector<8x8xf32> to vector<1x8x8xf32>
    tpu.vector_store %arg6[%c0_246, %c0_247, %c96], %272 {strides = array<i32>} : memref<1x8x128xf32, #tpu.memory_space<vmem>>, vector<1x8x8xf32>,
    %c13 = arith.constant 13 : index
    %c0_248 = arith.constant 0 : index
    %c0_249 = arith.constant 0 : index
    %273 = vector.load %arg1[%c13, %c0_248, %c0_249] : memref<16x8x16xf32, #tpu.memory_space<vmem>>, vector<1x8x16xf32>
    %274 = vector.shape_cast %273 : vector<1x8x16xf32> to vector<8x16xf32>
    %c13_250 = arith.constant 13 : index
    %c0_251 = arith.constant 0 : index
    %c0_252 = arith.constant 0 : index
    %275 = vector.load %arg2[%c13_250, %c0_251, %c0_252] : memref<16x16x32xf32, #tpu.memory_space<vmem>>, vector<1x16x32xf32>
    %276 = vector.shape_cast %275 : vector<1x16x32xf32> to vector<16x32xf32>
    %cst_253 = arith.constant dense<0.000000e+00> : vector<8x32xf32>
    %277 = tpu.matmul %274, %276, %cst_253 {dimension_numbers = #tpu.dot_dimension_numbers<[1], [0], [0], [1], [0, 0, 1, 1], [], []>} : vector<8x16xf32>, vector<16x32xf32>, vector<8x32xf32> -> vector<8x32xf32>
    %c13_254 = arith.constant 13 : index
    %c0_255 = arith.constant 0 : index
    %c0_256 = arith.constant 0 : index
    %278 = vector.load %arg3[%c13_254, %c0_255, %c0_256] : memref<16x1x32xf32, #tpu.memory_space<vmem>>, vector<1x1x32xf32>
    %279 = vector.shape_cast %278 : vector<1x1x32xf32> to vector<1x32xf32>
    %280 = vector.broadcast %279 : vector<1x32xf32> to vector<8x32xf32>
    %281 = arith.addf %277, %280 : vector<8x32xf32>
    %cst_257 = arith.constant 0.000000e+00 : f32
    %282 = vector.broadcast %cst_257 : f32 to vector<8x32xf32>
    %283 = arith.maximumf %281, %282 : vector<8x32xf32>
    %c13_258 = arith.constant 13 : index
    %c0_259 = arith.constant 0 : index
    %c0_260 = arith.constant 0 : index
    %284 = vector.load %arg4[%c13_258, %c0_259, %c0_260] : memref<16x32x8xf32, #tpu.memory_space<vmem>>, vector<1x32x8xf32>
    %285 = vector.shape_cast %284 : vector<1x32x8xf32> to vector<32x8xf32>
    %cst_261 = arith.constant dense<0.000000e+00> : vector<8x8xf32>
    %286 = tpu.matmul %283, %285, %cst_261 {dimension_numbers = #tpu.dot_dimension_numbers<[1], [0], [0], [1], [0, 0, 1, 1], [], []>} : vector<8x32xf32>, vector<32x8xf32>, vector<8x8xf32> -> vector<8x8xf32>
    %c13_262 = arith.constant 13 : index
    %c0_263 = arith.constant 0 : index
    %c0_264 = arith.constant 0 : index
    %287 = vector.load %arg5[%c13_262, %c0_263, %c0_264] : memref<16x1x8xf32, #tpu.memory_space<vmem>>, vector<1x1x8xf32>
    %288 = vector.shape_cast %287 : vector<1x1x8xf32> to vector<1x8xf32>
    %289 = vector.broadcast %288 : vector<1x8xf32> to vector<8x8xf32>
    %290 = arith.addf %286, %289 : vector<8x8xf32>
    %c0_265 = arith.constant 0 : index
    %c0_266 = arith.constant 0 : index
    %c104 = arith.constant 104 : index
    %291 = vector.load %arg6[%c0_265, %c0_266, %c104] : memref<1x8x128xf32, #tpu.memory_space<vmem>>, vector<1x8x8xf32>
    %292 = vector.shape_cast %291 : vector<1x8x8xf32> to vector<8x8xf32>
    %293 = vector.shape_cast %290 : vector<8x8xf32> to vector<1x8x8xf32>
    tpu.vector_store %arg6[%c0_265, %c0_266, %c104], %293 {strides = array<i32>} : memref<1x8x128xf32, #tpu.memory_space<vmem>>, vector<1x8x8xf32>,
    %c14 = arith.constant 14 : index
    %c0_267 = arith.constant 0 : index
    %c0_268 = arith.constant 0 : index
    %294 = vector.load %arg1[%c14, %c0_267, %c0_268] : memref<16x8x16xf32, #tpu.memory_space<vmem>>, vector<1x8x16xf32>
    %295 = vector.shape_cast %294 : vector<1x8x16xf32> to vector<8x16xf32>
    %c14_269 = arith.constant 14 : index
    %c0_270 = arith.constant 0 : index
    %c0_271 = arith.constant 0 : index
    %296 = vector.load %arg2[%c14_269, %c0_270, %c0_271] : memref<16x16x32xf32, #tpu.memory_space<vmem>>, vector<1x16x32xf32>
    %297 = vector.shape_cast %296 : vector<1x16x32xf32> to vector<16x32xf32>
    %cst_272 = arith.constant dense<0.000000e+00> : vector<8x32xf32>
    %298 = tpu.matmul %295, %297, %cst_272 {dimension_numbers = #tpu.dot_dimension_numbers<[1], [0], [0], [1], [0, 0, 1, 1], [], []>} : vector<8x16xf32>, vector<16x32xf32>, vector<8x32xf32> -> vector<8x32xf32>
    %c14_273 = arith.constant 14 : index
    %c0_274 = arith.constant 0 : index
    %c0_275 = arith.constant 0 : index
    %299 = vector.load %arg3[%c14_273, %c0_274, %c0_275] : memref<16x1x32xf32, #tpu.memory_space<vmem>>, vector<1x1x32xf32>
    %300 = vector.shape_cast %299 : vector<1x1x32xf32> to vector<1x32xf32>
    %301 = vector.broadcast %300 : vector<1x32xf32> to vector<8x32xf32>
    %302 = arith.addf %298, %301 : vector<8x32xf32>
    %cst_276 = arith.constant 0.000000e+00 : f32
    %303 = vector.broadcast %cst_276 : f32 to vector<8x32xf32>
    %304 = arith.maximumf %302, %303 : vector<8x32xf32>
    %c14_277 = arith.constant 14 : index
    %c0_278 = arith.constant 0 : index
    %c0_279 = arith.constant 0 : index
    %305 = vector.load %arg4[%c14_277, %c0_278, %c0_279] : memref<16x32x8xf32, #tpu.memory_space<vmem>>, vector<1x32x8xf32>
    %306 = vector.shape_cast %305 : vector<1x32x8xf32> to vector<32x8xf32>
    %cst_280 = arith.constant dense<0.000000e+00> : vector<8x8xf32>
    %307 = tpu.matmul %304, %306, %cst_280 {dimension_numbers = #tpu.dot_dimension_numbers<[1], [0], [0], [1], [0, 0, 1, 1], [], []>} : vector<8x32xf32>, vector<32x8xf32>, vector<8x8xf32> -> vector<8x8xf32>
    %c14_281 = arith.constant 14 : index
    %c0_282 = arith.constant 0 : index
    %c0_283 = arith.constant 0 : index
    %308 = vector.load %arg5[%c14_281, %c0_282, %c0_283] : memref<16x1x8xf32, #tpu.memory_space<vmem>>, vector<1x1x8xf32>
    %309 = vector.shape_cast %308 : vector<1x1x8xf32> to vector<1x8xf32>
    %310 = vector.broadcast %309 : vector<1x8xf32> to vector<8x8xf32>
    %311 = arith.addf %307, %310 : vector<8x8xf32>
    %c0_284 = arith.constant 0 : index
    %c0_285 = arith.constant 0 : index
    %c112 = arith.constant 112 : index
    %312 = vector.load %arg6[%c0_284, %c0_285, %c112] : memref<1x8x128xf32, #tpu.memory_space<vmem>>, vector<1x8x8xf32>
    %313 = vector.shape_cast %312 : vector<1x8x8xf32> to vector<8x8xf32>
    %314 = vector.shape_cast %311 : vector<8x8xf32> to vector<1x8x8xf32>
    tpu.vector_store %arg6[%c0_284, %c0_285, %c112], %314 {strides = array<i32>} : memref<1x8x128xf32, #tpu.memory_space<vmem>>, vector<1x8x8xf32>,
    %c15 = arith.constant 15 : index
    %c0_286 = arith.constant 0 : index
    %c0_287 = arith.constant 0 : index
    %315 = vector.load %arg1[%c15, %c0_286, %c0_287] : memref<16x8x16xf32, #tpu.memory_space<vmem>>, vector<1x8x16xf32>
    %316 = vector.shape_cast %315 : vector<1x8x16xf32> to vector<8x16xf32>
    %c15_288 = arith.constant 15 : index
    %c0_289 = arith.constant 0 : index
    %c0_290 = arith.constant 0 : index
    %317 = vector.load %arg2[%c15_288, %c0_289, %c0_290] : memref<16x16x32xf32, #tpu.memory_space<vmem>>, vector<1x16x32xf32>
    %318 = vector.shape_cast %317 : vector<1x16x32xf32> to vector<16x32xf32>
    %cst_291 = arith.constant dense<0.000000e+00> : vector<8x32xf32>
    %319 = tpu.matmul %316, %318, %cst_291 {dimension_numbers = #tpu.dot_dimension_numbers<[1], [0], [0], [1], [0, 0, 1, 1], [], []>} : vector<8x16xf32>, vector<16x32xf32>, vector<8x32xf32> -> vector<8x32xf32>
    %c15_292 = arith.constant 15 : index
    %c0_293 = arith.constant 0 : index
    %c0_294 = arith.constant 0 : index
    %320 = vector.load %arg3[%c15_292, %c0_293, %c0_294] : memref<16x1x32xf32, #tpu.memory_space<vmem>>, vector<1x1x32xf32>
    %321 = vector.shape_cast %320 : vector<1x1x32xf32> to vector<1x32xf32>
    %322 = vector.broadcast %321 : vector<1x32xf32> to vector<8x32xf32>
    %323 = arith.addf %319, %322 : vector<8x32xf32>
    %cst_295 = arith.constant 0.000000e+00 : f32
    %324 = vector.broadcast %cst_295 : f32 to vector<8x32xf32>
    %325 = arith.maximumf %323, %324 : vector<8x32xf32>
    %c15_296 = arith.constant 15 : index
    %c0_297 = arith.constant 0 : index
    %c0_298 = arith.constant 0 : index
    %326 = vector.load %arg4[%c15_296, %c0_297, %c0_298] : memref<16x32x8xf32, #tpu.memory_space<vmem>>, vector<1x32x8xf32>
    %327 = vector.shape_cast %326 : vector<1x32x8xf32> to vector<32x8xf32>
    %cst_299 = arith.constant dense<0.000000e+00> : vector<8x8xf32>
    %328 = tpu.matmul %325, %327, %cst_299 {dimension_numbers = #tpu.dot_dimension_numbers<[1], [0], [0], [1], [0, 0, 1, 1], [], []>} : vector<8x32xf32>, vector<32x8xf32>, vector<8x8xf32> -> vector<8x8xf32>
    %c15_300 = arith.constant 15 : index
    %c0_301 = arith.constant 0 : index
    %c0_302 = arith.constant 0 : index
    %329 = vector.load %arg5[%c15_300, %c0_301, %c0_302] : memref<16x1x8xf32, #tpu.memory_space<vmem>>, vector<1x1x8xf32>
    %330 = vector.shape_cast %329 : vector<1x1x8xf32> to vector<1x8xf32>
    %331 = vector.broadcast %330 : vector<1x8xf32> to vector<8x8xf32>
    %332 = arith.addf %328, %331 : vector<8x8xf32>
    %c0_303 = arith.constant 0 : index
    %c0_304 = arith.constant 0 : index
    %c120 = arith.constant 120 : index
    %333 = vector.load %arg6[%c0_303, %c0_304, %c120] : memref<1x8x128xf32, #tpu.memory_space<vmem>>, vector<1x8x8xf32>
    %334 = vector.shape_cast %333 : vector<1x8x8xf32> to vector<8x8xf32>
    %335 = vector.shape_cast %332 : vector<8x8xf32> to vector<1x8x8xf32>
    tpu.vector_store %arg6[%c0_303, %c0_304, %c120], %335 {strides = array<i32>} : memref<1x8x128xf32, #tpu.memory_space<vmem>>, vector<1x8x8xf32>,
    return
  }
  func.func @transform_0(%arg0: i32) -> (i32, i32, i32) {
    %c0_i32 = arith.constant 0 : i32
    %c0_i32_0 = arith.constant 0 : i32
    %c0_i32_1 = arith.constant 0 : i32
    return %arg0, %c0_i32, %c0_i32_0 : i32, i32, i32
  }
  func.func @transform_1(%arg0: i32) -> (i32, i32, i32) {
    %c0_i32 = arith.constant 0 : i32
    %c0_i32_0 = arith.constant 0 : i32
    %c0_i32_1 = arith.constant 0 : i32
    return %arg0, %c0_i32, %c0_i32_0 : i32, i32, i32
  }
  func.func @transform_2(%arg0: i32) -> (i32, i32, i32) {
    %c0_i32 = arith.constant 0 : i32
    %c0_i32_0 = arith.constant 0 : i32
    %c0_i32_1 = arith.constant 0 : i32
    return %arg0, %c0_i32, %c0_i32_0 : i32, i32, i32
  }
  func.func @transform_3(%arg0: i32) -> (i32, i32, i32) {
    %c0_i32 = arith.constant 0 : i32
    %c0_i32_0 = arith.constant 0 : i32
    %c0_i32_1 = arith.constant 0 : i32
    return %arg0, %c0_i32, %c0_i32_0 : i32, i32, i32
  }
  func.func @transform_4(%arg0: i32) -> (i32, i32, i32) {
    %c0_i32 = arith.constant 0 : i32
    %c0_i32_0 = arith.constant 0 : i32
    %c0_i32_1 = arith.constant 0 : i32
    return %arg0, %c0_i32, %c0_i32_0 : i32, i32, i32
  }
  func.func @transform_5(%arg0: i32) -> (i32, i32, i32) {
    %c0_i32 = arith.constant 0 : i32
    %c0_i32_0 = arith.constant 0 : i32
    %c0_i32_1 = arith.constant 0 : i32
    return %arg0, %c0_i32, %c0_i32_0 : i32, i32, i32
  }
}

</mosaic_0001>

<bundles_post_ra>
// kernel: tpu_custom_call.1
= control target key start
LH: loop header
LB: loop body
LE: loop exit
PB: predicated region body
PF: predicated region fallthrough
CT: control target
= control target key end

     0   :  { %10 = vsyncpa [#allocation3], 0  ;;  %s4674_s0 = inlined_call_operand.vmem [shape: f32[64,8,16], index: 0, kind: input, shape index: {}]   ;;  %s4675_s1 = inlined_call_operand.vmem [shape: f32[64,16,32], index: 1, kind: input, shape index: {}]   ;;  %s4676_s2 = inlined_call_operand.vmem [shape: f32[64,1,32], index: 2, kind: input, shape index: {}]   ;;  %s4677_s3 = inlined_call_operand.vmem [shape: f32[64,32,8], index: 3, kind: input, shape index: {}]   ;;  %s4678_s4 = inlined_call_operand.vmem [shape: f32[64,1,8], index: 4, kind: input, shape index: {}]   ;;  %s4679_s5 = inlined_call_operand.hbm [shape: f32[4,8,128], index: 5, kind: output, shape index: {}]  }
   0x1   :  { %12 = vsyncpa [#allocation3 + $0x1], 0  ;;  %s4235_s18 = smov 0   ;;  %s4237_s19 = smov 0  }
   0x2   :  { %s4239_s20 = smov 0   ;;  %s4241_s21 = smov 0  }
   0x3 LB: > { %s4256_s22 = sadd.s32 4294967295, %s4184_s21   ;;  %s3285_s23 = sadd.s32 4294967294, %s4184_s21   ;;  %s4184_s21 = sphi %s4241_s21, %s4685_s21   ;;  %s4180_s20 = sphi %s4239_s20, %s4684_s20   ;;  %s4176_s19 = sphi %s4237_s19, %s4683_s19   ;;  %s4172_s18 = sphi %s4235_s18, %s4682_s18  }
   0x4   : > { %s4260_s24 = sadd.s32 1, %s4184_s21   ;;  %s155_s25 = sadd.s32 1, %s4180_s20 }
   0x5   : > { %s152_s26 = ssub.s32 %s4184_s21, %s4260_s24  ;;  %p165_p0 = scmp.ne.s32.totalorder %s4180_s20, %s4176_s19 }
   0x6   : > { %p153_p1 = scmp.eq.s32.totalorder %s152_s26, 0  ;;  %p166_p2 = scmp.eq.s32.totalorder %s4256_s22, 3 }
   0x7   : > { %p171_p3 = scmp.ne.s32.totalorder %s4176_s19, %s4172_s18  ;;  %p172_p4 = scmp.eq.s32.totalorder %s3285_s23, 3 }
   0x8   : > { %s4271_s27 = scalar_select %p153_p1, %s4180_s20, %s155_s25  }
   0x9   : > { %p4273_p5 = por %p166_p2, %p165_p0  ;;  %p4277_p6 = por %p172_p4, %p171_p3 }
   0xa   : > { %p3288_p7 = scmp.ge.s32.totalorder %s4184_s21, 1  ;;  %p235_p8 = scmp.lt.s32.totalorder %s4184_s21, 5 }
   0xc   : > { %p236_p9 = pnand %p3288_p7, %p235_p8 }
   0xd   : > { %s3290_s30 = sshll.u32 (!%p236_p9), %s4256_s22, 4  ;;  %v4186_v0 = vmov (!%p236_p9), 0.0|0.0   ;;  %vm4187_vm0 = vmmov (!%p236_p9), 0   ;;  %v4188_v1 = vmov (!%p236_p9), 0.0   ;;  %vm323_vm1 = vcmask (!%p236_p9), 130048   ;;  %s4191_s15 = smov (!%p236_p9), 24  }
   0xe   : > { %239 = sbr.rel (%p236_p9) target bundleno = 2130 (0x852), region = 40  ;;  %3921 = vmatprep.subr.bf16.mxu1 (!%p236_p9), %v4186_v0  ;;  %3930 = vmatprep.subr.bf16.mxu0 (!%p236_p9), %v4186_v0  ;;  %p284_p10 = scmp.lt.s32.totalorder (!%p236_p9), %s3290_s30, 63  ;;  %vm409_vm2 = vcmask (!%p236_p9), 261120   ;;  %vm483_vm3 = vcmask (!%p236_p9), 64512   ;;  %vm662_vm4 = vcmask (!%p236_p9), 130112   ;;  %vm841_vm5 = vcmask (!%p236_p9), 195712  }
   0xf   : > { %3637 = vmatprep.mubr.msk.f32.mxu1 (!%p236_p9), %vm4187_vm0, %v4188_v1  ;;  %3655 = vmatprep.mubr.msk.f32.mxu0 (!%p236_p9), %vm4187_vm0, %v4188_v1  ;;  %vm1020_vm6 = vcmask (!%p236_p9), 261312   ;;  %s4192_s16 = smov (!%p236_p9), 32   ;;  %s4193_s23 = smov (!%p236_p9), 40   ;;  %vm1199_vm7 = vcmask (!%p236_p9), 326912   ;;  %vm1378_vm8 = vcmask (!%p236_p9), 392512   ;;  %vm1557_vm9 = vcmask (!%p236_p9), 458112  }
  0x10   : > { %s4194_s25 = smov (!%p236_p9), 48   ;;  %vm1736_vm10 = vcmask (!%p236_p9), 523712   ;;  %s4196_s8 = smov (!%p236_p9), 64   ;;  %vm1915_vm11 = vcmask (!%p236_p9), 589312   ;;  %vm2094_vm12 = vcmask (!%p236_p9), 654912   ;;  %vm2273_vm13 = vcmask (!%p236_p9), 720512  }
  0x11   : > { %vm2452_vm14 = vcmask (!%p236_p9), 786112   ;;  %vm2631_vm15 = vcmask (!%p236_p9), 851712  }
  0x15   : > { %s4687_s30 = smov (!%p284_p10, %s3290_s30), 63 }
  0x16   : > { %s3503_s6 = sshll.u32 %s4687_s30, 4  ;;  %s3504_s7 = sshll.u32 %s4687_s30, 5 }
  0x17   : > { %s4297_s10 = scalar_lea.vmem %s4675_s1, %s3503_s6  ;;  %s4302_s13 = scalar_lea.vmem %s4677_s3, %s3504_s7 }
  0x18   : > { %v314_v2 = vld [vmem:[%s4297_s10] sm:$0xff]  ;;  %v315_v3 = vld [vmem:[%s4297_s10 + $0x8] sm:$0xff]  ;;  %v3305_v4 = vld [vmem:[%s4297_s10 + $0x10] sm:$0xff]  ;;  %s3291_s14 = sshll.u32 %s4687_s30, 3  ;;  %s4340_s26 = scalar_lea.vmem %s4676_s2, %s4687_s30 }
  0x19   : > { %v3922_v5 = vpack.c.bf16 %v315_v3, %v314_v2  ;;  %v3306_v6 = vld [vmem:[%s4297_s10 + $0x18] sm:$0xff]  ;;  %s4312_s17 = scalar_lea.vmem %s4674_s0, %s3291_s14  ;;  %v398_v7 = vld [vmem:[%s4302_s13] sm:$0xff]  ;;  %v399_v8 = vld [vmem:[%s4302_s13 + $0x8] sm:$0xff]  ;;  %s280_s6 = sand.u32 1, %s4176_s19  }
  0x1a   : > { %v3931_v9 = vpack.c.bf16 %v3306_v6, %v3305_v4  ;;  %v3310_v10 = vld [vmem:[%s4302_s13 + $0x20] sm:$0xff]  ;;  %v3925_v12 = vpack.c.bf16 %v399_v8, %v398_v7  ;;  %v3311_v13 = vld [vmem:[%s4302_s13 + $0x28] sm:$0xff]  ;;  %v400_v16 = vld [vmem:[%s4302_s13 + $0x10] sm:$0xff]  ;;  %s4381_s9 = scalar_lea.vmem %s4678_s4, %s4687_s30  ;;  %s3289_s11 = sshll.u32 %s280_s6, 3 }
  0x1b   : > { %3923 = vmatpush3.bf16.msra.mxu1 %v3922_v5  ;;  %v313_v11 = vld [vmem:[%s4312_s17] sm:$0xff]  ;;  %v3304_v14 = vld [vmem:[%s4312_s17 + $0x8] sm:$0xff]  ;;  %v3934_v15 = vpack.c.bf16 %v3311_v13, %v3310_v10  ;;  %v401_v17 = vld [vmem:[%s4302_s13 + $0x18] sm:$0xff]  ;;  %s4388_s12 = scalar_lea.vmem [#allocation2], %s3289_s11  ;;  %s4189_s30 = smov 8  }
  0x1c   : > { %3932 = vmatpush3.bf16.msra.mxu0 %v3931_v9  ;;  %3924 = vmatprep.subr.bf16.mxu1 %v4186_v0  ;;  %v3312_v18 = vld [vmem:[%s4302_s13 + $0x30] sm:$0xff]  ;;  %v3928_v19 = vpack.c.bf16 %v401_v17, %v400_v16  ;;  %v3313_v20 = vld [vmem:[%s4302_s13 + $0x38] sm:$0xff]  ;;  %v3300_v22 = vld [vmem:[%s4340_s26] ss:$0 sm:$0xff]  ;;  %s4190_s14 = smov 16   ;;  %s4195_s7 = smov 56  }
  0x1d   : > { %3933 = vmatprep.subr.bf16.mxu0 %v4186_v0  ;;  %v3937_v21 = vpack.c.bf16 %v3313_v20, %v3312_v18  ;;  %v3308_v23 = vld [vmem:[%s4340_s26 + $0x1] ss:$0 sm:$0xff]  ;;  %v3319_v25 = vld [vmem:[%s4297_s10 + $0x28] sm:$0xff]  ;;  %v3331_v27 = vld [vmem:[%s4297_s10 + $0x30] sm:$0xff]  ;;  %s4197_s11 = smov 72  }
  0x1e   : > { %3638 = vmatmul.mubr.msk.f32.vlgmr.msra.gmra.mrb[0].mxu1 %vm323_vm1, %v313_v11  ;;  %v3318_v24 = vld [vmem:[%s4297_s10 + $0x20] sm:$0xff]  ;;  %v3332_v28 = vld [vmem:[%s4297_s10 + $0x38] sm:$0xff]  ;;  %v3317_v38 = vld [vmem:[%s4312_s17 + $0x10] sm:$0xff] }
  0x1f   : > { %3656 = vmatmul.mubr.msk.f32.vlgmr.msra.gmra.mrb[0].mxu0 %vm323_vm1, %v3304_v14  ;;  %3926 = vmatpush3.bf16.msra.mxu1 %v3925_v12  ;;  %v3940_v34 = vpack.c.bf16 %v3319_v25, %v3318_v24  ;;  %v3949_v36 = vpack.c.bf16 %v3332_v28, %v3331_v27  ;;  %v3330_v39 = vld [vmem:[%s4312_s17 + $0x18] sm:$0xff]  ;;  %v3323_v40 = vld [vmem:[%s4302_s13 + $0x40] sm:$0xff]  ;;  %v3324_v41 = vld [vmem:[%s4302_s13 + $0x48] sm:$0xff] }
  0x20   : > { %3935 = vmatpush3.bf16.msra.mxu0 %v3934_v15  ;;  %3927 = vmatprep.subr.bf16.mxu1 %v4186_v0  ;;  %v3336_v42 = vld [vmem:[%s4302_s13 + $0x60] sm:$0xff]  ;;  %v3943_v43 = vpack.c.bf16 %v3324_v41, %v3323_v40  ;;  %v3337_v44 = vld [vmem:[%s4302_s13 + $0x68] sm:$0xff]  ;;  %v3325_v46 = vld [vmem:[%s4302_s13 + $0x50] sm:$0xff] }
  0x21   : > { %3936 = vmatprep.subr.bf16.mxu0 %v4186_v0  ;;  %3648 = vmatprep.mubr.msk.f32.mxu1 %vm4187_vm0, %v4188_v1  ;;  %v3952_v45 = vpack.c.bf16 %v3337_v44, %v3336_v42  ;;  %v3326_v47 = vld [vmem:[%s4302_s13 + $0x58] sm:$0xff]  ;;  %v3338_v49 = vld [vmem:[%s4302_s13 + $0x70] sm:$0xff]  ;;  %v3302_v52 = vld [vmem:[%s4381_s9] ss:$0 sm:$0xff] }
  0x22   : > { %3666 = vmatprep.mubr.msk.f32.mxu0 %vm4187_vm0, %v4188_v1  ;;  %v3946_v48 = vpack.c.bf16 %v3326_v47, %v3325_v46  ;;  %v3339_v50 = vld [vmem:[%s4302_s13 + $0x78] sm:$0xff]  ;;  %v3315_v53 = vld [vmem:[%s4381_s9 + $0x1] ss:$0 sm:$0xff]  ;;  %v3321_v60 = vld [vmem:[%s4340_s26 + $0x2] ss:$0 sm:$0xff] }
  0x23   : > { %3929 = vmatpush3.bf16.msra.mxu1 %v3928_v19  ;;  %v3955_v51 = vpack.c.bf16 %v3339_v50, %v3338_v49  ;;  %v3334_v61 = vld [vmem:[%s4340_s26 + $0x3] ss:$0 sm:$0xff]  ;;  %v3345_v63 = vld [vmem:[%s4297_s10 + $0x48] sm:$0xff]  ;;  %v3357_v3 = vld [vmem:[%s4297_s10 + $0x50] sm:$0xff] }
  0x24   : > { %3938 = vmatpush3.bf16.msra.mxu0 %v3937_v21  ;;  %3939 = vmatprep.subr.bf16.mxu1 %v4186_v0  ;;  %v3344_v62 = vld [vmem:[%s4297_s10 + $0x40] sm:$0xff]  ;;  %v3358_v4 = vld [vmem:[%s4297_s10 + $0x58] sm:$0xff]  ;;  %v3356_v15 = vld [vmem:[%s4312_s17 + $0x28] sm:$0xff] }
  0x25   : > { %3948 = vmatprep.subr.bf16.mxu0 %v4186_v0  ;;  %v3958_v10 = vpack.c.bf16 %v3345_v63, %v3344_v62  ;;  %v3967_v12 = vpack.c.bf16 %v3358_v4, %v3357_v3  ;;  %v3343_v14 = vld [vmem:[%s4312_s17 + $0x20] sm:$0xff]  ;;  %v3350_v17 = vld [vmem:[%s4302_s13 + $0x88] sm:$0xff]  ;;  %v3364_v25 = vld [vmem:[%s4302_s13 + $0xb0] sm:$0xff] }
  0x26   : > { %v3349_v16 = vld [vmem:[%s4302_s13 + $0x80] sm:$0xff]  ;;  %v3363_v20 = vld [vmem:[%s4302_s13 + $0xa8] sm:$0xff]  ;;  %v3383_v42 = vld [vmem:[%s4297_s10 + $0x70] sm:$0xff] }
  0x27   : > { %v3362_v18 = vld [vmem:[%s4302_s13 + $0xa0] sm:$0xff]  ;;  %v3961_v19 = vpack.c.bf16 %v3350_v17, %v3349_v16  ;;  %v3371_v40 = vld [vmem:[%s4297_s10 + $0x68] sm:$0xff]  ;;  %v3378_v62 = vld [vmem:[%s4302_s13 + $0xd8] sm:$0xff] }
  0x28   : > { %v3970_v21 = vpack.c.bf16 %v3363_v20, %v3362_v18  ;;  %v3390_v63 = vld [vmem:[%s4302_s13 + $0xf0] sm:$0xff]  ;;  %v3391_v3 = vld [vmem:[%s4302_s13 + $0xf8] sm:$0xff]  ;;  %v3386_v16 = vld [vmem:[%s4340_s26 + $0x7] ss:$0 sm:$0xff] }
  0x29   : > { %v3991_v4 = vpack.c.bf16 %v3391_v3, %v3390_v63  ;;  %v3396_v17 = vld [vmem:[%s4297_s10 + $0x80] sm:$0xff]  ;;  %v3397_v18 = vld [vmem:[%s4297_s10 + $0x88] sm:$0xff]  ;;  %v3409_v20 = vld [vmem:[%s4297_s10 + $0x90] sm:$0xff] }
  0xf1   : > { %v393_v26 = vpop.f32.mrb[0].mxu1 }
  0xf2   : > { %v394_v29 = vadd.f32 %v3300_v22, %v393_v26  ;;  %v567_v30 = vpop.f32.mrb[0].mxu0  ;;  %v3639_v31 = vpop.f32.mrb[1].mxu1  ;;  %v3351_v22 = vld [vmem:[%s4302_s13 + $0x90] sm:$0xff]  ;;  %v3365_v26 = vld [vmem:[%s4302_s13 + $0xb8] sm:$0xff] }
  0xf3   : > { %v568_v32 = vadd.f32 %v3308_v23, %v567_v30  ;;  %v3657_v33 = vpop.f32.mrb[1].mxu0  ;;  %v3352_v23 = vld [vmem:[%s4302_s13 + $0x98] sm:$0xff]  ;;  %v3973_v27 = vpack.c.bf16 %v3365_v26, %v3364_v25  ;;  %v3341_v30 = vld [vmem:[%s4381_s9 + $0x3] ss:$0 sm:$0xff] }
  0xf4   : > { %v397_v35 = vmax.f32 %v394_v29, 0.0  ;;  %v3964_v24 = vpack.c.bf16 %v3352_v23, %v3351_v22  ;;  %v3328_v29 = vld [vmem:[%s4381_s9 + $0x2] ss:$0 sm:$0xff] }
  0xf5   : > { %v571_v37 = vmax.f32 %v568_v32, 0.0 }
  0xf6   : > { %3649 = vmatmul.mubr.msk.f32.vlgmr.msra.gmra.mrb[2].mxu1 %vm409_vm2, %v397_v35 }
  0xf7   : > { %3667 = vmatmul.mubr.msk.f32.vlgmr.msra.gmra.mrb[2].mxu0 %vm409_vm2, %v571_v37  ;;  %3941 = vmatpush3.bf16.msra.mxu1 %v3940_v34  ;;  %v3347_v37 = vld [vmem:[%s4340_s26 + $0x4] ss:$0 sm:$0xff] }
  0xf8   : > { %3950 = vmatpush3.bf16.msra.mxu0 %v3949_v36  ;;  %3673 = vmatprep.mubr.msk.f32.mxu1 %vm4187_vm0, %v4188_v1 }
  0xf9   : > { %3691 = vmatprep.mubr.msk.f32.mxu0 %vm4187_vm0, %v4188_v1  ;;  %3942 = vmatprep.subr.bf16.mxu1 %v4186_v0 }
  0xfa   : > { %3674 = vmatmul.mubr.msk.f32.vlgmr.msra.gmra.mrb[4].mxu1 %vm323_vm1, %v3317_v38  ;;  %3951 = vmatprep.subr.bf16.mxu0 %v4186_v0  ;;  %v3360_v38 = vld [vmem:[%s4340_s26 + $0x5] ss:$0 sm:$0xff] }
  0xfb   : > { %3692 = vmatmul.mubr.msk.f32.vlgmr.msra.gmra.mrb[4].mxu0 %vm323_vm1, %v3330_v39  ;;  %3684 = vmatprep.mubr.msk.f32.mxu1 %vm4187_vm0, %v4188_v1  ;;  %v3370_v39 = vld [vmem:[%s4297_s10 + $0x60] sm:$0xff] }
  0xfc   : > { %3702 = vmatprep.mubr.msk.f32.mxu0 %vm4187_vm0, %v4188_v1  ;;  %3944 = vmatpush3.bf16.msra.mxu1 %v3943_v43  ;;  %v3384_v43 = vld [vmem:[%s4297_s10 + $0x78] sm:$0xff]  ;;  %v3976_v49 = vpack.c.bf16 %v3371_v40, %v3370_v39  ;;  %v3403_v39 = vld [vmem:[%s4302_s13 + $0x110] sm:$0xff] }
  0xfd   : > { %3953 = vmatpush3.bf16.msra.mxu0 %v3952_v45  ;;  %3945 = vmatprep.subr.bf16.mxu1 %v4186_v0  ;;  %v3404_v40 = vld [vmem:[%s4302_s13 + $0x118] sm:$0xff] }
  0xfe   : > { %3954 = vmatprep.subr.bf16.mxu0 %v4186_v0 }
 0x100   : > { %3947 = vmatpush3.bf16.msra.mxu1 %v3946_v48 }
 0x101   : > { %3956 = vmatpush3.bf16.msra.mxu0 %v3955_v51  ;;  %3957 = vmatprep.subr.bf16.mxu1 %v4186_v0  ;;  %v3985_v51 = vpack.c.bf16 %v3384_v43, %v3383_v42  ;;  %v4000_v42 = vpack.c.bf16 %v3404_v40, %v3403_v39  ;;  %v3417_v43 = vld [vmem:[%s4302_s13 + $0x138] sm:$0xff] }
 0x102   : > { %3966 = vmatprep.subr.bf16.mxu0 %v4186_v0  ;;  %v3462_v39 = vld [vmem:[%s4297_s10 + $0xd8] sm:$0xff] }
 0x1c9   : > { %v479_v54 = vpop.f32.mrb[2].mxu1 }
 0x1ca   : > { %v480_v55 = vadd.f32 %v3302_v52, %v479_v54  ;;  %v654_v56 = vpop.f32.mrb[2].mxu0  ;;  %v3650_v57 = vpop.f32.mrb[3].mxu1  ;;  %v3382_v54 = vld [vmem:[%s4312_s17 + $0x38] sm:$0xff] }
 0x1cb   : > { %v655_v58 = vadd.f32 %v3315_v53, %v654_v56  ;;  %v3668_v59 = vpop.f32.mrb[3].mxu0  ;;  %v3369_v53 = vld [vmem:[%s4312_s17 + $0x30] sm:$0xff]  ;;  %v3376_v56 = vld [vmem:[%s4302_s13 + $0xc8] sm:$0xff]  ;;  %v3388_v57 = vld [vmem:[%s4302_s13 + $0xe0] sm:$0xff] }
 0x1cc   : > { %484 = vst.msk [vmem:[%s4388_s12] sm:$0xff] %vm483_vm3, %v480_v55  ;;  %v3375_v55 = vld [vmem:[%s4302_s13 + $0xc0] sm:$0xff]  ;;  %v3389_v59 = vld [vmem:[%s4302_s13 + $0xe8] sm:$0xff] }
 0x1cd   : > { %659 = vrot.lane.b32.xlu0 %v655_v58, %s4189_s30  ;;  %v746_v2 = vpop.f32.mrb[4].mxu1  ;;  %v3979_v58 = vpack.c.bf16 %v3376_v56, %v3375_v55  ;;  %v3399_v55 = vld [vmem:[%s4340_s26 + $0x8] ss:$0 sm:$0xff]  ;;  %v3412_v56 = vld [vmem:[%s4340_s26 + $0x9] ss:$0 sm:$0xff]  ;;  %s4198_s30 = smov 80  }
 0x1ce   : > { %v747_v5 = vadd.f32 %v3321_v60, %v746_v2  ;;  %v925_v6 = vpop.f32.mrb[4].mxu0  ;;  %v3675_v7 = vpop.f32.mrb[5].mxu1  ;;  %v3988_v60 = vpack.c.bf16 %v3389_v59, %v3388_v57  ;;  %v3422_v57 = vld [vmem:[%s4297_s10 + $0xa0] sm:$0xff] }
 0x1cf   : > { %v926_v8 = vadd.f32 %v3334_v61, %v925_v6  ;;  %v3693_v9 = vpop.f32.mrb[5].mxu0  ;;  %v3377_v61 = vld [vmem:[%s4302_s13 + $0xd0] sm:$0xff]  ;;  %v3354_v7 = vld [vmem:[%s4381_s9 + $0x4] ss:$0 sm:$0xff] }
 0x1d0   : > { %v750_v11 = vmax.f32 %v747_v5, 0.0  ;;  %v3982_v2 = vpack.c.bf16 %v3378_v62, %v3377_v61  ;;  %v3436_v61 = vld [vmem:[%s4297_s10 + $0xb8] sm:$0xff] }
 0x1d1   : > { %v929_v13 = vmax.f32 %v926_v8, 0.0  ;;  %v3367_v8 = vld [vmem:[%s4381_s9 + $0x5] ss:$0 sm:$0xff] }
 0x1d2   : > { %3685 = vmatmul.mubr.msk.f32.vlgmr.msra.gmra.mrb[6].mxu1 %vm409_vm2, %v750_v11 }
 0x1d3   : > { %3703 = vmatmul.mubr.msk.f32.vlgmr.msra.gmra.mrb[6].mxu0 %vm409_vm2, %v929_v13  ;;  %3959 = vmatpush3.bf16.msra.mxu1 %v3958_v10 }
 0x1d4   : > { %3968 = vmatpush3.bf16.msra.mxu0 %v3967_v12  ;;  %3709 = vmatprep.mubr.msk.f32.mxu1 %vm4187_vm0, %v4188_v1 }
 0x1d5   : > { %3727 = vmatprep.mubr.msk.f32.mxu0 %vm4187_vm0, %v4188_v1  ;;  %3960 = vmatprep.subr.bf16.mxu1 %v4186_v0 }
 0x1d6   : > { %3710 = vmatmul.mubr.msk.f32.vlgmr.msra.gmra.mrb[8].mxu1 %vm323_vm1, %v3343_v14  ;;  %3969 = vmatprep.subr.bf16.mxu0 %v4186_v0 }
 0x1d7   : > { %3728 = vmatmul.mubr.msk.f32.vlgmr.msra.gmra.mrb[8].mxu0 %vm323_vm1, %v3356_v15  ;;  %3720 = vmatprep.mubr.msk.f32.mxu1 %vm4187_vm0, %v4188_v1  ;;  %v3373_v15 = vld [vmem:[%s4340_s26 + $0x6] ss:$0 sm:$0xff] }
 0x1d8   : > { %3738 = vmatprep.mubr.msk.f32.mxu0 %vm4187_vm0, %v4188_v1  ;;  %3962 = vmatpush3.bf16.msra.mxu1 %v3961_v19 }
 0x1d9   : > { %3971 = vmatpush3.bf16.msra.mxu0 %v3970_v21  ;;  %3963 = vmatprep.subr.bf16.mxu1 %v4186_v0  ;;  %v3410_v21 = vld [vmem:[%s4297_s10 + $0x98] sm:$0xff] }
 0x1da   : > { %3972 = vmatprep.subr.bf16.mxu0 %v4186_v0 }
 0x1dc   : > { %3965 = vmatpush3.bf16.msra.mxu1 %v3964_v24 }
 0x1dd   : > { %3974 = vmatpush3.bf16.msra.mxu0 %v3973_v27  ;;  %3975 = vmatprep.subr.bf16.mxu1 %v4186_v0  ;;  %v3994_v27 = vpack.c.bf16 %v3397_v18, %v3396_v17  ;;  %v3429_v17 = vld [vmem:[%s4302_s13 + $0x150] sm:$0xff]  ;;  %v3430_v18 = vld [vmem:[%s4302_s13 + $0x158] sm:$0xff] }
 0x1de   : > { %3984 = vmatprep.subr.bf16.mxu0 %v4186_v0 }
 0x23f   : > { %v660_v28 = vpop.permute.xlu0 %659 }
 0x240   : > { %663 = vst.msk [vmem:[%s4388_s12] sm:$0xff] %vm662_vm4, %v660_v28 }
 0x2a5   : > { %v833_v31 = vpop.f32.mrb[6].mxu1 }
 0x2a6   : > { %v834_v32 = vadd.f32 %v3328_v29, %v833_v31  ;;  %v1012_v33 = vpop.f32.mrb[6].mxu0  ;;  %v3686_v34 = vpop.f32.mrb[7].mxu1  ;;  %v4003_v29 = vpack.c.bf16 %v3410_v21, %v3409_v20  ;;  %v3395_v31 = vld [vmem:[%s4312_s17 + $0x40] sm:$0xff]  ;;  %v4018_v20 = vpack.c.bf16 %v3430_v18, %v3429_v17  ;;  %v3443_v21 = vld [vmem:[%s4302_s13 + $0x178] sm:$0xff] }
 0x2a7   : > { %v1013_v35 = vadd.f32 %v3341_v30, %v1012_v33  ;;  %v3704_v36 = vpop.f32.mrb[7].mxu0  ;;  %v3401_v33 = vld [vmem:[%s4302_s13 + $0x100] sm:$0xff]  ;;  %v3402_v34 = vld [vmem:[%s4302_s13 + $0x108] sm:$0xff]  ;;  %v3488_v17 = vld [vmem:[%s4297_s10 + $0xf8] sm:$0xff] }
 0x2a8   : > { %838 = vrot.lane.b32.xlu0 %v834_v32, %s4190_s14  ;;  %v3408_v32 = vld [vmem:[%s4312_s17 + $0x48] sm:$0xff]  ;;  %v3997_v36 = vpack.c.bf16 %v3402_v34, %v3401_v33  ;;  %s4199_s14 = smov 88  }
 0x2a9   : > { %1017 = vrot.lane.b32.xlu1 %v1013_v35, %s4191_s15  ;;  %v1104_v41 = vpop.f32.mrb[8].mxu1  ;;  %v3414_v35 = vld [vmem:[%s4302_s13 + $0x120] sm:$0xff]  ;;  %v3425_v33 = vld [vmem:[%s4340_s26 + $0xa] ss:$0 sm:$0xff]  ;;  %v3438_v34 = vld [vmem:[%s4340_s26 + $0xb] ss:$0 sm:$0xff] }
 0x2aa   : > { %v1105_v44 = vadd.f32 %v3347_v37, %v1104_v41  ;;  %v1283_v45 = vpop.f32.mrb[8].mxu0  ;;  %v3711_v46 = vpop.f32.mrb[9].mxu1  ;;  %v3415_v37 = vld [vmem:[%s4302_s13 + $0x128] sm:$0xff]  ;;  %v3416_v41 = vld [vmem:[%s4302_s13 + $0x130] sm:$0xff]  ;;  %s3500_s15 = sshll.u32 %s4256_s22, 7 }
 0x2ab   : > { %v1284_v47 = vadd.f32 %v3360_v38, %v1283_v45  ;;  %v3729_v48 = vpop.f32.mrb[9].mxu0  ;;  %v4006_v38 = vpack.c.bf16 %v3415_v37, %v3414_v35  ;;  %v3448_v35 = vld [vmem:[%s4297_s10 + $0xc0] sm:$0xff] }
 0x2ac   : > { %v1108_v50 = vmax.f32 %v1105_v44, 0.0  ;;  %v4009_v44 = vpack.c.bf16 %v3417_v43, %v3416_v41  ;;  %v3393_v48 = vld [vmem:[%s4381_s9 + $0x7] ss:$0 sm:$0xff] }
 0x2ad   : > { %v1287_v52 = vmax.f32 %v1284_v47, 0.0  ;;  %v3380_v47 = vld [vmem:[%s4381_s9 + $0x6] ss:$0 sm:$0xff] }
 0x2ae   : > { %3721 = vmatmul.mubr.msk.f32.vlgmr.msra.gmra.mrb[10].mxu1 %vm409_vm2, %v1108_v50 }
 0x2af   : > { %3739 = vmatmul.mubr.msk.f32.vlgmr.msra.gmra.mrb[10].mxu0 %vm409_vm2, %v1287_v52  ;;  %3977 = vmatpush3.bf16.msra.mxu1 %v3976_v49 }
 0x2b0   : > { %3986 = vmatpush3.bf16.msra.mxu0 %v3985_v51  ;;  %3745 = vmatprep.mubr.msk.f32.mxu1 %vm4187_vm0, %v4188_v1 }
 0x2b1   : > { %3763 = vmatprep.mubr.msk.f32.mxu0 %vm4187_vm0, %v4188_v1  ;;  %3978 = vmatprep.subr.bf16.mxu1 %v4186_v0 }
 0x2b2   : > { %3746 = vmatmul.mubr.msk.f32.vlgmr.msra.gmra.mrb[12].mxu1 %vm323_vm1, %v3369_v53  ;;  %3987 = vmatprep.subr.bf16.mxu0 %v4186_v0 }
 0x2b3   : > { %3764 = vmatmul.mubr.msk.f32.vlgmr.msra.gmra.mrb[12].mxu0 %vm323_vm1, %v3382_v54  ;;  %3756 = vmatprep.mubr.msk.f32.mxu1 %vm4187_vm0, %v4188_v1 }
 0x2b4   : > { %3774 = vmatprep.mubr.msk.f32.mxu0 %vm4187_vm0, %v4188_v1  ;;  %3980 = vmatpush3.bf16.msra.mxu1 %v3979_v58  ;;  %v3423_v58 = vld [vmem:[%s4297_s10 + $0xa8] sm:$0xff] }
 0x2b5   : > { %3989 = vmatpush3.bf16.msra.mxu0 %v3988_v60  ;;  %3981 = vmatprep.subr.bf16.mxu1 %v4186_v0  ;;  %v3435_v60 = vld [vmem:[%s4297_s10 + $0xb0] sm:$0xff] }
 0x2b6   : > { %3990 = vmatprep.subr.bf16.mxu0 %v4186_v0 }
 0x2b8   : > { %3983 = vmatpush3.bf16.msra.mxu1 %v3982_v2 }
 0x2b9   : > { %3992 = vmatpush3.bf16.msra.mxu0 %v3991_v4  ;;  %3993 = vmatprep.subr.bf16.mxu1 %v4186_v0 }
 0x2ba   : > { %4002 = vmatprep.subr.bf16.mxu0 %v4186_v0 }
 0x31a   : > { %v839_v5 = vpop.permute.xlu0 %838 }
 0x31b   : > { %842 = vst.msk [vmem:[%s4388_s12] sm:$0xff] %vm841_vm5, %v839_v5  ;;  %v1018_v6 = vpop.permute.xlu1 %1017  ;;  %v4012_v5 = vpack.c.bf16 %v3423_v58, %v3422_v57  ;;  %v3455_v57 = vld [vmem:[%s4302_s13 + $0x190] sm:$0xff]  ;;  %v3456_v58 = vld [vmem:[%s4302_s13 + $0x198] sm:$0xff] }
 0x31c   : > { %1021 = vst.msk [vmem:[%s4388_s12] sm:$0xff] %vm1020_vm6, %v1018_v6 }
 0x381   : > { %v1191_v9 = vpop.f32.mrb[10].mxu1 }
 0x382   : > { %v1192_v10 = vadd.f32 %v3354_v7, %v1191_v9  ;;  %v1370_v11 = vpop.f32.mrb[10].mxu0  ;;  %v3722_v12 = vpop.f32.mrb[11].mxu1  ;;  %v4021_v7 = vpack.c.bf16 %v3436_v61, %v3435_v60  ;;  %v3421_v9 = vld [vmem:[%s4312_s17 + $0x50] sm:$0xff]  ;;  %v4036_v60 = vpack.c.bf16 %v3456_v58, %v3455_v57  ;;  %v3469_v61 = vld [vmem:[%s4302_s13 + $0x1b8] sm:$0xff] }
 0x383   : > { %v1371_v13 = vadd.f32 %v3367_v8, %v1370_v11  ;;  %v3740_v14 = vpop.f32.mrb[11].mxu0  ;;  %v3427_v11 = vld [vmem:[%s4302_s13 + $0x140] sm:$0xff]  ;;  %v3428_v12 = vld [vmem:[%s4302_s13 + $0x148] sm:$0xff] }
 0x384   : > { %1196 = vrot.lane.b32.xlu1 %v1192_v10, %s4192_s16  ;;  %v3434_v10 = vld [vmem:[%s4312_s17 + $0x58] sm:$0xff]  ;;  %v4015_v14 = vpack.c.bf16 %v3428_v12, %v3427_v11  ;;  %v3451_v11 = vld [vmem:[%s4340_s26 + $0xc] ss:$0 sm:$0xff]  ;;  %v3464_v12 = vld [vmem:[%s4340_s26 + $0xd] ss:$0 sm:$0xff]  ;;  %s3184_s16 = sshll.u32 %s4388_s12, 4  ;;  %s4630_s16 = int_to_ptr.vmem [resolvable:$true] %s3184_s16 }
 0x385   : > { %1375 = vrot.lane.b32.xlu0 %v1371_v13, %s4193_s23  ;;  %v1462_v19 = vpop.f32.mrb[12].mxu1  ;;  %v3440_v13 = vld [vmem:[%s4302_s13 + $0x160] sm:$0xff]  ;;  %s4122_s22 = scalar_lea.vmem %s4630_s16, 128 }
 0x386   : > { %v1641_v22 = vpop.f32.mrb[12].mxu0  ;;  %v1463_v23 = vadd.f32 %v3373_v15, %v1462_v19  ;;  %v3747_v24 = vpop.f32.mrb[13].mxu1  ;;  %v3441_v15 = vld [vmem:[%s4302_s13 + $0x168] sm:$0xff]  ;;  %v3442_v19 = vld [vmem:[%s4302_s13 + $0x170] sm:$0xff]  ;;  %p4123_p11 = scmp.ne.s32.totalorder %s4630_s16, %s4122_s22 }
 0x387   : > { %v1642_v25 = vadd.f32 %v3386_v16, %v1641_v22  ;;  %v3765_v26 = vpop.f32.mrb[13].mxu0  ;;  %v4024_v16 = vpack.c.bf16 %v3441_v15, %v3440_v13  ;;  %v4027_v22 = vpack.c.bf16 %v3443_v21, %v3442_v19  ;;  %v3474_v13 = vld [vmem:[%s4297_s10 + $0xe0] sm:$0xff] }
 0x388   : > { %v1466_v28 = vmax.f32 %v1463_v23, 0.0  ;;  %v3419_v26 = vld [vmem:[%s4381_s9 + $0x9] ss:$0 sm:$0xff]  ;;  %p4124_p12 = pnand %p4123_p11, %p4273_p5 }
 0x389   : > { %v1645_v30 = vmax.f32 %v1642_v25, 0.0  ;;  %v3406_v25 = vld [vmem:[%s4381_s9 + $0x8] ss:$0 sm:$0xff] }
 0x38a   : > { %3757 = vmatmul.mubr.msk.f32.vlgmr.msra.gmra.mrb[14].mxu1 %vm409_vm2, %v1466_v28  ;;  %p4125_p13 = pneg %p4124_p12 }
 0x38b   : > { %3775 = vmatmul.mubr.msk.f32.vlgmr.msra.gmra.mrb[14].mxu0 %vm409_vm2, %v1645_v30  ;;  %3995 = vmatpush3.bf16.msra.mxu1 %v3994_v27 }
 0x38c   : > { %4004 = vmatpush3.bf16.msra.mxu0 %v4003_v29  ;;  %3781 = vmatprep.mubr.msk.f32.mxu1 %vm4187_vm0, %v4188_v1 }
 0x38d   : > { %3799 = vmatprep.mubr.msk.f32.mxu0 %vm4187_vm0, %v4188_v1  ;;  %3996 = vmatprep.subr.bf16.mxu1 %v4186_v0 }
 0x38e   : > { %3782 = vmatmul.mubr.msk.f32.vlgmr.msra.gmra.mrb[16].mxu1 %vm323_vm1, %v3395_v31  ;;  %4005 = vmatprep.subr.bf16.mxu0 %v4186_v0 }
 0x38f   : > { %3800 = vmatmul.mubr.msk.f32.vlgmr.msra.gmra.mrb[16].mxu0 %vm323_vm1, %v3408_v32  ;;  %3792 = vmatprep.mubr.msk.f32.mxu1 %vm4187_vm0, %v4188_v1 }
 0x390   : > { %3810 = vmatprep.mubr.msk.f32.mxu0 %vm4187_vm0, %v4188_v1  ;;  %3998 = vmatpush3.bf16.msra.mxu1 %v3997_v36  ;;  %v3449_v36 = vld [vmem:[%s4297_s10 + $0xc8] sm:$0xff] }
 0x391   : > { %4007 = vmatpush3.bf16.msra.mxu0 %v4006_v38  ;;  %3999 = vmatprep.subr.bf16.mxu1 %v4186_v0  ;;  %v3461_v38 = vld [vmem:[%s4297_s10 + $0xd0] sm:$0xff] }
 0x392   : > { %4008 = vmatprep.subr.bf16.mxu0 %v4186_v0 }
 0x394   : > { %4001 = vmatpush3.bf16.msra.mxu1 %v4000_v42 }
 0x395   : > { %4010 = vmatpush3.bf16.msra.mxu0 %v4009_v44  ;;  %4011 = vmatprep.subr.bf16.mxu1 %v4186_v0 }
 0x396   : > { %4020 = vmatprep.subr.bf16.mxu0 %v4186_v0 }
 0x3f6   : > { %v1197_v45 = vpop.permute.xlu1 %1196 }
 0x3f7   : > { %1200 = vst.msk [vmem:[%s4388_s12] sm:$0xff] %vm1199_vm7, %v1197_v45  ;;  %v1376_v46 = vpop.permute.xlu0 %1375  ;;  %v4030_v45 = vpack.c.bf16 %v3449_v36, %v3448_v35  ;;  %v3481_v35 = vld [vmem:[%s4302_s13 + $0x1d0] sm:$0xff]  ;;  %v3482_v36 = vld [vmem:[%s4302_s13 + $0x1d8] sm:$0xff] }
 0x3f8   : > { %1379 = vst.msk [vmem:[%s4388_s12] sm:$0xff] %vm1378_vm8, %v1376_v46 }
 0x45d   : > { %v1549_v49 = vpop.f32.mrb[14].mxu1 }
 0x45e   : > { %v1550_v50 = vadd.f32 %v3380_v47, %v1549_v49  ;;  %v1728_v51 = vpop.f32.mrb[14].mxu0  ;;  %v3758_v52 = vpop.f32.mrb[15].mxu1  ;;  %v4039_v47 = vpack.c.bf16 %v3462_v39, %v3461_v38  ;;  %v3447_v49 = vld [vmem:[%s4312_s17 + $0x60] sm:$0xff]  ;;  %v3495_v38 = vld [vmem:[%s4302_s13 + $0x1f8] sm:$0xff] }
 0x45f   : > { %v1729_v53 = vadd.f32 %v3393_v48, %v1728_v51  ;;  %v3776_v54 = vpop.f32.mrb[15].mxu0  ;;  %v3453_v51 = vld [vmem:[%s4302_s13 + $0x180] sm:$0xff]  ;;  %v3454_v52 = vld [vmem:[%s4302_s13 + $0x188] sm:$0xff] }
 0x460   : > { %1554 = vrot.lane.b32.xlu1 %v1550_v50, %s4194_s25  ;;  %v3460_v50 = vld [vmem:[%s4312_s17 + $0x68] sm:$0xff]  ;;  %v4033_v54 = vpack.c.bf16 %v3454_v52, %v3453_v51  ;;  %s4628_s25 = scalar_lea.hbm %s4679_s5, %s3500_s15 }
 0x461   : > { %1733 = vrot.lane.b32.xlu0 %v1729_v53, %s4195_s7  ;;  %v1820_v59 = vpop.f32.mrb[16].mxu1  ;;  %v3466_v53 = vld [vmem:[%s4302_s13 + $0x1a0] sm:$0xff]  ;;  %s3171_s7 = scalar_lea.sflag [#allocation3], %s280_s6 }
 0x462   : > { %v1999_v62 = vpop.f32.mrb[16].mxu0  ;;  %v1821_v63 = vadd.f32 %v3399_v55, %v1820_v59  ;;  %v3783_v2 = vpop.f32.mrb[17].mxu1  ;;  %v3467_v55 = vld [vmem:[%s4302_s13 + $0x1a8] sm:$0xff]  ;;  %v3468_v59 = vld [vmem:[%s4302_s13 + $0x1b0] sm:$0xff] }
 0x463   : > { %v2000_v3 = vadd.f32 %v3412_v56, %v1999_v62  ;;  %v3801_v4 = vpop.f32.mrb[17].mxu0  ;;  %v4042_v56 = vpack.c.bf16 %v3467_v55, %v3466_v53  ;;  %v4045_v62 = vpack.c.bf16 %v3469_v61, %v3468_v59  ;;  %v3484_v61 = vld [vmem:[%s4381_s9 + $0xe] ss:$0 sm:$0xff] }
 0x464   : > { %v1824_v6 = vmax.f32 %v1821_v63, 0.0  ;;  %v3445_v4 = vld [vmem:[%s4381_s9 + $0xb] ss:$0 sm:$0xff] }
 0x465   : > { %v2003_v8 = vmax.f32 %v2000_v3, 0.0  ;;  %v3432_v3 = vld [vmem:[%s4381_s9 + $0xa] ss:$0 sm:$0xff] }
 0x466   : > { %3793 = vmatmul.mubr.msk.f32.vlgmr.msra.gmra.mrb[18].mxu1 %vm409_vm2, %v1824_v6 }
 0x467   : > { %3811 = vmatmul.mubr.msk.f32.vlgmr.msra.gmra.mrb[18].mxu0 %vm409_vm2, %v2003_v8  ;;  %4013 = vmatpush3.bf16.msra.mxu1 %v4012_v5 }
 0x468   : > { %4022 = vmatpush3.bf16.msra.mxu0 %v4021_v7  ;;  %3817 = vmatprep.mubr.msk.f32.mxu1 %vm4187_vm0, %v4188_v1 }
 0x469   : > { %3835 = vmatprep.mubr.msk.f32.mxu0 %vm4187_vm0, %v4188_v1  ;;  %4014 = vmatprep.subr.bf16.mxu1 %v4186_v0 }
 0x46a   : > { %3818 = vmatmul.mubr.msk.f32.vlgmr.msra.gmra.mrb[20].mxu1 %vm323_vm1, %v3421_v9  ;;  %4023 = vmatprep.subr.bf16.mxu0 %v4186_v0 }
 0x46b   : > { %3836 = vmatmul.mubr.msk.f32.vlgmr.msra.gmra.mrb[20].mxu0 %vm323_vm1, %v3434_v10  ;;  %3828 = vmatprep.mubr.msk.f32.mxu1 %vm4187_vm0, %v4188_v1 }
 0x46c   : > { %3846 = vmatprep.mubr.msk.f32.mxu0 %vm4187_vm0, %v4188_v1  ;;  %4016 = vmatpush3.bf16.msra.mxu1 %v4015_v14  ;;  %v3475_v14 = vld [vmem:[%s4297_s10 + $0xe8] sm:$0xff] }
 0x46d   : > { %4025 = vmatpush3.bf16.msra.mxu0 %v4024_v16  ;;  %4017 = vmatprep.subr.bf16.mxu1 %v4186_v0  ;;  %v3487_v16 = vld [vmem:[%s4297_s10 + $0xf0] sm:$0xff]  ;;  %s4200_s10 = smov 96  }
 0x46e   : > { %4026 = vmatprep.subr.bf16.mxu0 %v4186_v0 }
 0x470   : > { %4019 = vmatpush3.bf16.msra.mxu1 %v4018_v20 }
 0x471   : > { %4028 = vmatpush3.bf16.msra.mxu0 %v4027_v22  ;;  %4029 = vmatprep.subr.bf16.mxu1 %v4186_v0 }
 0x472   : > { %4038 = vmatprep.subr.bf16.mxu0 %v4186_v0 }
 0x4d2   : > { %v1555_v23 = vpop.permute.xlu1 %1554 }
 0x4d3   : > { %1558 = vst.msk [vmem:[%s4388_s12] sm:$0xff] %vm1557_vm9, %v1555_v23  ;;  %v1734_v24 = vpop.permute.xlu0 %1733  ;;  %v4048_v23 = vpack.c.bf16 %v3475_v14, %v3474_v13 }
 0x4d4   : > { %1737 = vst.msk [vmem:[%s4388_s12] sm:$0xff] %vm1736_vm10, %v1734_v24 }
 0x539   : > { %v1907_v27 = vpop.f32.mrb[18].mxu1 }
 0x53a   : > { %v1908_v28 = vadd.f32 %v3406_v25, %v1907_v27  ;;  %v2086_v29 = vpop.f32.mrb[18].mxu0  ;;  %v3794_v30 = vpop.f32.mrb[19].mxu1  ;;  %v4057_v25 = vpack.c.bf16 %v3488_v17, %v3487_v16  ;;  %v3473_v27 = vld [vmem:[%s4312_s17 + $0x70] sm:$0xff] }
 0x53b   : > { %v2087_v31 = vadd.f32 %v3419_v26, %v2086_v29  ;;  %v3812_v32 = vpop.f32.mrb[19].mxu0  ;;  %v3479_v29 = vld [vmem:[%s4302_s13 + $0x1c0] sm:$0xff]  ;;  %v3480_v30 = vld [vmem:[%s4302_s13 + $0x1c8] sm:$0xff] }
 0x53c   : > { %1912 = vrot.lane.b32.xlu1 %v1908_v28, %s4196_s8  ;;  %v3486_v28 = vld [vmem:[%s4312_s17 + $0x78] sm:$0xff]  ;;  %v4051_v32 = vpack.c.bf16 %v3480_v30, %v3479_v29  ;;  %s4202_s17 = smov 112   ;;  %s4204_s8 = smov [#allocation2]  }
 0x53d   : > { %2091 = vrot.lane.b32.xlu0 %v2087_v31, %s4197_s11  ;;  %v2178_v37 = vpop.f32.mrb[20].mxu1  ;;  %v3492_v31 = vld [vmem:[%s4302_s13 + $0x1e0] sm:$0xff]  ;;  %s4126_s11 = sshll.u32 %s4204_s8, 4  ;;  %s4127_s11 = int_to_ptr.vmem [resolvable:$false] %s4126_s11 }
 0x53e   : > { %v2357_v40 = vpop.f32.mrb[20].mxu0  ;;  %v2179_v41 = vadd.f32 %v3425_v33, %v2178_v37  ;;  %v3819_v42 = vpop.f32.mrb[21].mxu1  ;;  %v3493_v33 = vld [vmem:[%s4302_s13 + $0x1e8] sm:$0xff]  ;;  %v3494_v37 = vld [vmem:[%s4302_s13 + $0x1f0] sm:$0xff]  ;;  %s4201_s13 = smov 104   ;;  %p4129_p0 = scmp.lt.s32.totalorder %s4630_s16, %s4127_s11 }
 0x53f   : > { %v2358_v43 = vadd.f32 %v3438_v34, %v2357_v40  ;;  %v3837_v44 = vpop.f32.mrb[21].mxu0  ;;  %v4060_v34 = vpack.c.bf16 %v3493_v33, %v3492_v31  ;;  %v4063_v39 = vpack.c.bf16 %v3495_v38, %v3494_v37  ;;  %v3458_v42 = vld [vmem:[%s4381_s9 + $0xc] ss:$0 sm:$0xff] }
 0x540   : > { %v2182_v46 = vmax.f32 %v2179_v41, 0.0 }
 0x541   : > { %v2361_v48 = vmax.f32 %v2358_v43, 0.0  ;;  %v3471_v43 = vld [vmem:[%s4381_s9 + $0xd] ss:$0 sm:$0xff] }
 0x542   : > { %3829 = vmatmul.mubr.msk.f32.vlgmr.msra.gmra.mrb[22].mxu1 %vm409_vm2, %v2182_v46 }
 0x543   : > { %3847 = vmatmul.mubr.msk.f32.vlgmr.msra.gmra.mrb[22].mxu0 %vm409_vm2, %v2361_v48  ;;  %4031 = vmatpush3.bf16.msra.mxu1 %v4030_v45 }
 0x544   : > { %4040 = vmatpush3.bf16.msra.mxu0 %v4039_v47  ;;  %3853 = vmatprep.mubr.msk.f32.mxu1 %vm4187_vm0, %v4188_v1 }
 0x545   : > { %3871 = vmatprep.mubr.msk.f32.mxu0 %vm4187_vm0, %v4188_v1  ;;  %4032 = vmatprep.subr.bf16.mxu1 %v4186_v0 }
 0x546   : > { %3854 = vmatmul.mubr.msk.f32.vlgmr.msra.gmra.mrb[24].mxu1 %vm323_vm1, %v3447_v49  ;;  %4041 = vmatprep.subr.bf16.mxu0 %v4186_v0  ;;  %v3477_v49 = vld [vmem:[%s4340_s26 + $0xe] ss:$0 sm:$0xff] }
 0x547   : > { %3872 = vmatmul.mubr.msk.f32.vlgmr.msra.gmra.mrb[24].mxu0 %vm323_vm1, %v3460_v50  ;;  %3864 = vmatprep.mubr.msk.f32.mxu1 %vm4187_vm0, %v4188_v1  ;;  %v3490_v50 = vld [vmem:[%s4340_s26 + $0xf] ss:$0 sm:$0xff]  ;;  %s4203_s26 = smov 120  }
 0x548   : > { %3882 = vmatprep.mubr.msk.f32.mxu0 %vm4187_vm0, %v4188_v1  ;;  %4034 = vmatpush3.bf16.msra.mxu1 %v4033_v54 }
 0x549   : > { %4043 = vmatpush3.bf16.msra.mxu0 %v4042_v56  ;;  %4035 = vmatprep.subr.bf16.mxu1 %v4186_v0 }
 0x54a   : > { %4044 = vmatprep.subr.bf16.mxu0 %v4186_v0 }
 0x54c   : > { %4037 = vmatpush3.bf16.msra.mxu1 %v4036_v60 }
 0x54d   : > { %4046 = vmatpush3.bf16.msra.mxu0 %v4045_v62  ;;  %4047 = vmatprep.subr.bf16.mxu1 %v4186_v0  ;;  %v3497_v62 = vld [vmem:[%s4381_s9 + $0xf] ss:$0 sm:$0xff] }
 0x54e   : > { %4056 = vmatprep.subr.bf16.mxu0 %v4186_v0 }
 0x5ae   : > { %v1913_v63 = vpop.permute.xlu1 %1912 }
 0x5af   : > { %1916 = vst.msk [vmem:[%s4388_s12] sm:$0xff] %vm1915_vm11, %v1913_v63  ;;  %v2092_v2 = vpop.permute.xlu0 %2091 }
 0x5b0   : > { %2095 = vst.msk [vmem:[%s4388_s12] sm:$0xff] %vm2094_vm12, %v2092_v2 }
 0x615   : > { %v2265_v5 = vpop.f32.mrb[22].mxu1 }
 0x616   : > { %v2266_v6 = vadd.f32 %v3432_v3, %v2265_v5  ;;  %v2444_v7 = vpop.f32.mrb[22].mxu0  ;;  %v3830_v8 = vpop.f32.mrb[23].mxu1 }
 0x617   : > { %v2445_v9 = vadd.f32 %v3445_v4, %v2444_v7  ;;  %v3848_v10 = vpop.f32.mrb[23].mxu0 }
 0x618   : > { %2270 = vrot.lane.b32.xlu1 %v2266_v6, %s4198_s30  ;;  %s4128_s30 = scalar_lea.vmem %s4127_s11, 256 }
 0x619   : > { %2449 = vrot.lane.b32.xlu0 %v2445_v9, %s4199_s14  ;;  %v2536_v15 = vpop.f32.mrb[24].mxu1  ;;  %p4130_p1 = scmp.lt.s32.totalorder %s4128_s30, %s4122_s22 }
 0x61a   : > { %v2715_v18 = vpop.f32.mrb[24].mxu0  ;;  %v2537_v19 = vadd.f32 %v3451_v11, %v2536_v15  ;;  %v3855_v20 = vpop.f32.mrb[25].mxu1 }
 0x61b   : > { %v2716_v21 = vadd.f32 %v3464_v12, %v2715_v18  ;;  %v3873_v22 = vpop.f32.mrb[25].mxu0  ;;  %p4131_p2 = por %p4130_p1, %p4129_p0 }
 0x61c   : > { %v2540_v24 = vmax.f32 %v2537_v19, 0.0 }
 0x61d   : > { %v2719_v26 = vmax.f32 %v2716_v21, 0.0  ;;  %p4132_p3 = pnand %p4131_p2, %p4125_p13 }
 0x61e   : > { %3865 = vmatmul.mubr.msk.f32.vlgmr.msra.gmra.mrb[26].mxu1 %vm409_vm2, %v2540_v24 }
 0x61f   : > { %3883 = vmatmul.mubr.msk.f32.vlgmr.msra.gmra.mrb[26].mxu0 %vm409_vm2, %v2719_v26  ;;  %4049 = vmatpush3.bf16.msra.mxu1 %v4048_v23 }
 0x620   : > { %4058 = vmatpush3.bf16.msra.mxu0 %v4057_v25  ;;  %3889 = vmatprep.mubr.msk.f32.mxu1 %vm4187_vm0, %v4188_v1 }
 0x621   : > { %3907 = vmatprep.mubr.msk.f32.mxu0 %vm4187_vm0, %v4188_v1  ;;  %4050 = vmatprep.subr.bf16.mxu1 %v4186_v0 }
 0x622   : > { %3890 = vmatmul.mubr.msk.f32.vlgmr.msra.gmra.mrb[28].mxu1 %vm323_vm1, %v3473_v27  ;;  %4059 = vmatprep.subr.bf16.mxu0 %v4186_v0 }
 0x623   : > { %3908 = vmatmul.mubr.msk.f32.vlgmr.msra.gmra.mrb[28].mxu0 %vm323_vm1, %v3486_v28  ;;  %3900 = vmatprep.mubr.msk.f32.mxu1 %vm4187_vm0, %v4188_v1  ;;  %vm2989_vm1 = vcmask 982912  }
 0x624   : > { %3918 = vmatprep.mubr.msk.f32.mxu0 %vm4187_vm0, %v4188_v1  ;;  %4052 = vmatpush3.bf16.msra.mxu1 %v4051_v32  ;;  %v4054_v1 = vpack.c.bf16 %v3482_v36, %v3481_v35  ;;  %vm2810_vm0 = vcmask 917312  }
 0x625   : > { %4061 = vmatpush3.bf16.msra.mxu0 %v4060_v34  ;;  %4053 = vmatprep.subr.bf16.mxu1 %v4186_v0 }
 0x626   : > { %4062 = vmatprep.subr.bf16.mxu0 %v4186_v0 }
 0x628   : > { %4055 = vmatpush3.bf16.msra.mxu1 %v4054_v1 }
 0x629   : > { %4064 = vmatpush3.bf16.msra.mxu0 %v4063_v39 }
 0x68a   : > { %v2271_v40 = vpop.permute.xlu1 %2270 }
 0x68b   : > { %2274 = vst.msk [vmem:[%s4388_s12] sm:$0xff] %vm2273_vm13, %v2271_v40  ;;  %v2450_v41 = vpop.permute.xlu0 %2449 }
 0x68c   : > { %2453 = vst.msk [vmem:[%s4388_s12] sm:$0xff] %vm2452_vm14, %v2450_v41 }
 0x6f1   : > { %v2623_v44 = vpop.f32.mrb[26].mxu1 }
 0x6f2   : > { %v2624_v45 = vadd.f32 %v3458_v42, %v2623_v44  ;;  %v2802_v46 = vpop.f32.mrb[26].mxu0  ;;  %v3866_v47 = vpop.f32.mrb[27].mxu1 }
 0x6f3   : > { %v2803_v0 = vadd.f32 %v3471_v43, %v2802_v46  ;;  %v3884_v48 = vpop.f32.mrb[27].mxu0 }
 0x6f4   : > { %2628 = vrot.lane.b32.xlu1 %v2624_v45, %s4200_s10 }
 0x6f5   : > { %2807 = vrot.lane.b32.xlu0 %v2803_v0, %s4201_s13  ;;  %v2894_v51 = vpop.f32.mrb[28].mxu1 }
 0x6f6   : > { %v3073_v52 = vpop.f32.mrb[28].mxu0  ;;  %v2895_v53 = vadd.f32 %v3477_v49, %v2894_v51  ;;  %v3891_v54 = vpop.f32.mrb[29].mxu1 }
 0x6f7   : > { %v3074_v55 = vadd.f32 %v3490_v50, %v3073_v52  ;;  %v3909_v56 = vpop.f32.mrb[29].mxu0 }
 0x6f8   : > { %v2898_v57 = vmax.f32 %v2895_v53, 0.0 }
 0x6f9   : > { %v3077_v58 = vmax.f32 %v3074_v55, 0.0 }
 0x6fa   : > { %3901 = vmatmul.mubr.msk.f32.vlgmr.msra.gmra.mrb[30].mxu1 %vm409_vm2, %v2898_v57 }
 0x6fb   : > { %3919 = vmatmul.mubr.msk.f32.vlgmr.msra.gmra.mrb[30].mxu0 %vm409_vm2, %v3077_v58  ;;  %vm3168_vm2 = vcmask 1048512  }
 0x766   : > { %v2629_v59 = vpop.permute.xlu1 %2628 }
 0x767   : > { %2632 = vst.msk [vmem:[%s4388_s12] sm:$0xff] %vm2631_vm15, %v2629_v59  ;;  %v2808_v60 = vpop.permute.xlu0 %2807 }
 0x768   : > { %2811 = vst.msk [vmem:[%s4388_s12] sm:$0xff] %vm2810_vm0, %v2808_v60 }
 0x7cd   : > { %v2981_v63 = vpop.f32.mrb[30].mxu1 }
 0x7ce   : > { %v2982_v2 = vadd.f32 %v3484_v61, %v2981_v63  ;;  %v3160_v3 = vpop.f32.mrb[30].mxu0  ;;  %v3902_v4 = vpop.f32.mrb[31].mxu1 }
 0x7cf   : > { %v3161_v5 = vadd.f32 %v3497_v62, %v3160_v3  ;;  %v3920_v6 = vpop.f32.mrb[31].mxu0 }
 0x7d0   : > { %2986 = vrot.lane.b32.xlu1 %v2982_v2, %s4202_s17 }
 0x7d1   : > { %3165 = vrot.lane.b32.xlu0 %v3161_v5, %s4203_s26 }
 0x842   : > { %v2987_v7 = vpop.permute.xlu1 %2986 }
 0x843   : > { %2990 = vst.msk [vmem:[%s4388_s12] sm:$0xff] %vm2989_vm1, %v2987_v7  ;;  %v3166_v8 = vpop.permute.xlu0 %3165 }
 0x844   : > { %3169 = vst.msk [vmem:[%s4388_s12] sm:$0xff] %vm3168_vm2, %v3166_v8 }
 0x845   : > { %4135 = shalt.err (!%p4132_p3)
}
 0x846   : > { %s4136_s6 = scalar_lea.hbm %s4628_s25, 128  ;;  %s4140_s10 = scalar_lea.hbm %s4679_s5, 512 }
 0x847   : > { %p4137_p4 = scmp.ne.s32.totalorder %s4628_s25, %s4136_s6  ;;  %p4141_p9 = scmp.lt.u32.totalorder %s4628_s25, %s4679_s5 }
 0x848   : > { %p4142_p10 = scmp.lt.u32.totalorder %s4140_s10, %s4136_s6  ;;  %p4144_p12 = scmp.lt.u32.totalorder %s4136_s6, %s4628_s25 }
 0x849   : > { %p4138_p7 = pnand %p4137_p4, %p4273_p5 }
 0x84a   : > { %p4143_p11 = por %p4142_p10, %p4141_p9 }
 0x84b   : > { %p4139_p8 = pneg %p4138_p7 }
 0x84c   : > { %p4145_p13 = por %p4144_p12, %p4143_p11 }
 0x84e   : > { %p4146_p0 = pnand %p4145_p13, %p4139_p8 }
 0x850   : > { %4149 = shalt.err (!%p4146_p0)
}
 0x851   : > { %4065 = dma.vmem_to_hbm [thread:$0]  (%p4273_p5), %s4630_s16, 128, %s4628_s25, %s3171_s7  }
 0x852 PF: > { %p4071_p1 = scmp.ge.s32.totalorder %s4184_s21, 2  ;;  %s3196_s26 = sand.u32 1, %s4172_s18  }
 0x853   : > { %s3197_s15 = scalar_lea.sflag [#allocation3], %s3196_s26 }
 0x854   : > { %p4068_p2 = pnand %p4071_p1, %p4277_p6 }
 0x856   : > { %4167 = dma.done.wait (!%p4068_p2), %s3197_s15, 128  }
 0x857   : > { %4169 = vsyncadd (!%p4068_p2), %s3197_s15, 4294967168  ;;  %p15_p3 = scmp.ge.s32.totalorder %s4260_s24, 6   ;;  %s4682_s18 = smov %s4176_s19 }
 0x858   : > { %s4683_s19 = smov %s4180_s20  ;;  %s4684_s20 = smov %s4271_s27 }
 0x859   : > { %s4685_s21 = smov %s4260_s24  ;;  %17 = sbr.rel (!%p15_p3) target bundleno = 3 (0x3), region = 162 }
 0x860   :  { %3202 = vsyncpa [#allocation3], 1 }
 0x861   :  { %3204 = vsyncpa [#allocation3 + $0x1], 1 }

</bundles_post_ra>
